<compile_context>
chip_gen: v5e
topology: v5e:2x2
jax: 0.10.0
libtpu: 0.0.40
codegen_flags: <defaults>
</compile_context>

<pallas_src>
import numpy as np

import jax
import jax.numpy as jnp
from jax.experimental import pallas as pl
from jax.experimental.pallas import tpu as pltpu


# --------------------------------------------------------------------------
# Parameter preprocessing (pure-JAX glue on weights only; tiny)
# --------------------------------------------------------------------------
def _conv_to_banded(w_oihw, w_in):
    """(O, I, kh, kw) conv weight -> (kh, W_in*I, Wo*O) banded matmul weights.

    Using activation layout X[h, w*I + c], the valid conv is
        Y[i, j*O + o] = sum_di (X[i+di, :] @ Wm[di])[j*O + o]   (+ bias)
    """
    O, I, kh, kw = w_oihw.shape
    wo = w_in - kw + 1
    jw = jnp.arange(w_in)[:, None]            # (W_in, 1)  input col index
    j = jnp.arange(wo)[None, :]               # (1, Wo)    output col index
    dj = jw - j                               # (W_in, Wo)
    valid = (dj >= 0) & (dj < kw)
    djc = jnp.clip(dj, 0, kw - 1)
    w_perm = jnp.transpose(w_oihw, (2, 3, 1, 0))        # (kh, kw, I, O)
    g = w_perm[:, djc]                                  # (kh, W_in, Wo, I, O)
    g = jnp.where(valid[None, :, :, None, None], g, 0.0)
    g = jnp.transpose(g, (0, 1, 3, 2, 4))               # (kh, W_in, I, Wo, O)
    return g.reshape(kh, w_in * I, wo * O).astype(jnp.float32)


def _pool_row_mat(h_out):
    """(h_out, 2*h_out) matrix summing row pairs, scaled by 0.5."""
    return jnp.asarray(
        0.5 * np.repeat(np.eye(h_out, dtype=np.float32), 2, axis=1))


def _pool_col_mat(w_out, c):
    """(2*w_out*c, w_out*c) matrix summing column(-group) pairs, scaled 0.5."""
    a = np.repeat(np.eye(w_out, dtype=np.float32), 2, axis=0)   # (2*w_out, w_out)
    return jnp.asarray(0.5 * np.kron(a, np.eye(c, dtype=np.float32)))


# --------------------------------------------------------------------------
# Fused Pallas kernel: full LeNet forward for one image per grid step
# --------------------------------------------------------------------------
def _lenet_kernel(x_ref, w1_ref, b1_ref, pr1_ref, pc1_ref,
                  w2_ref, b2_ref, pr2_ref, pc2_ref,
                  w3_ref, b3_ref, fc1w_ref, fc1b_ref, fc2w_ref, fc2b_ref,
                  o_ref, p1_scr, p2_scr):
    f32 = jnp.float32

    # conv1 (5x5, 1->6) + tanh: 5 row-shifted banded matmuls, (28, 168)
    acc = jnp.zeros((28, 168), f32)
    for di in range(5):
        acc += jnp.dot(x_ref[0, di:di + 28, :], w1_ref[di],
                       preferred_element_type=f32)
    y1 = jnp.tanh(acc + b1_ref[...])

    # avgpool 2x2 + tanh (two tiny matmuls), -> (14, 84), kept in VMEM scratch
    p1 = jnp.dot(pr1_ref[...], y1, preferred_element_type=f32)     # (14, 168)
    p1 = jnp.dot(p1, pc1_ref[...], preferred_element_type=f32)     # (14, 84)
    p1_scr[...] = jnp.tanh(p1)

    # conv2 (5x5, 6->16) + tanh: (10, 160)
    acc = jnp.zeros((10, 160), f32)
    for di in range(5):
        acc += jnp.dot(p1_scr[di:di + 10, :], w2_ref[di],
                       preferred_element_type=f32)
    y2 = jnp.tanh(acc + b2_ref[...])

    # avgpool 2x2 + tanh -> (5, 80)
    p2 = jnp.dot(pr2_ref[...], y2, preferred_element_type=f32)     # (5, 160)
    p2 = jnp.dot(p2, pc2_ref[...], preferred_element_type=f32)     # (5, 80)
    p2_scr[...] = jnp.tanh(p2)

    # conv3 (5x5, 16->120) + tanh -> (1, 120)  (== flatten order of torch.view)
    acc = jnp.zeros((1, 120), f32)
    for di in range(5):
        acc += jnp.dot(p2_scr[di:di + 1, :], w3_ref[di],
                       preferred_element_type=f32)
    y3 = jnp.tanh(acc + b3_ref[...])

    # fc1 + tanh, fc2 + tanh
    h = jnp.tanh(jnp.dot(y3, fc1w_ref[...], preferred_element_type=f32)
                 + fc1b_ref[...])                                   # (1, 84)
    out = jnp.tanh(jnp.dot(h, fc2w_ref[...], preferred_element_type=f32)
                   + fc2b_ref[...])                                 # (1, 10)
    o_ref[0] = out


# --------------------------------------------------------------------------
# LeNet params + forward
# --------------------------------------------------------------------------
def init_lenet_params(key):
    ks = jax.random.split(key, 10)

    def conv_init(kw_, kb_, o, i, k):
        scale = 1.0 / jnp.sqrt(i * k * k)
        w = jax.random.uniform(kw_, (o, i, k, k), jnp.float32, -scale, scale)
        b = jax.random.uniform(kb_, (o,), jnp.float32, -scale, scale)
        return w, b

    def fc_init(kw_, kb_, i, o):
        scale = 1.0 / jnp.sqrt(i)
        w = jax.random.uniform(kw_, (i, o), jnp.float32, -scale, scale)
        b = jax.random.uniform(kb_, (o,), jnp.float32, -scale, scale)
        return w, b

    p = {}
    p["conv1_w"], p["conv1_b"] = conv_init(ks[0], ks[1], 6, 1, 5)
    p["conv2_w"], p["conv2_b"] = conv_init(ks[2], ks[3], 16, 6, 5)
    p["conv3_w"], p["conv3_b"] = conv_init(ks[4], ks[5], 120, 16, 5)
    p["fc1_w"], p["fc1_b"] = fc_init(ks[6], ks[7], 120, 84)
    p["fc2_w"], p["fc2_b"] = fc_init(ks[8], ks[9], 84, 10)
    return p


def lenet_forward(x_nchw, params):
    x = x_nchw.astype(jnp.float32)
    B, Cin, H, W = x.shape
    assert Cin == 1 and H == 32 and W == 32, "LeNet expects (B, 1, 32, 32)"
    x_img = x[:, 0]                                        # (B, 32, 32)

    # Precompute banded conv matrices / pool matrices / tiled biases (tiny).
    w1m = _conv_to_banded(params["conv1_w"], 32)           # (5, 32, 168)
    b1r = jnp.tile(params["conv1_b"], 28).reshape(1, 168)
    w2m = _conv_to_banded(params["conv2_w"], 14)           # (5, 84, 160)
    b2r = jnp.tile(params["conv2_b"], 10).reshape(1, 160)
    w3m = _conv_to_banded(params["conv3_w"], 5)            # (5, 80, 120)
    b3r = params["conv3_b"].reshape(1, 120)
    pr1, pc1 = _pool_row_mat(14), _pool_col_mat(14, 6)     # (14,28), (168,84)
    pr2, pc2 = _pool_row_mat(5), _pool_col_mat(5, 16)      # (5,10),  (160,80)
    fc1w, fc1b = params["fc1_w"], params["fc1_b"].reshape(1, 84)
    fc2w, fc2b = params["fc2_w"], params["fc2_b"].reshape(1, 10)

    out = pl.pallas_call(
        _lenet_kernel,
        out_shape=jax.ShapeDtypeStruct((B, 1, 10), jnp.float32),
        grid=(B,),
        in_specs=[
            pl.BlockSpec((1, 32, 32), lambda b: (b, 0, 0)),      # x (per image)
            pl.BlockSpec((5, 32, 168), lambda b: (0, 0, 0)),     # w1m
            pl.BlockSpec((1, 168), lambda b: (0, 0)),            # b1r
            pl.BlockSpec((14, 28), lambda b: (0, 0)),            # pr1
            pl.BlockSpec((168, 84), lambda b: (0, 0)),           # pc1
            pl.BlockSpec((5, 84, 160), lambda b: (0, 0, 0)),     # w2m
            pl.BlockSpec((1, 160), lambda b: (0, 0)),            # b2r
            pl.BlockSpec((5, 10), lambda b: (0, 0)),             # pr2
            pl.BlockSpec((160, 80), lambda b: (0, 0)),           # pc2
            pl.BlockSpec((5, 80, 120), lambda b: (0, 0, 0)),     # w3m
            pl.BlockSpec((1, 120), lambda b: (0, 0)),            # b3r
            pl.BlockSpec((120, 84), lambda b: (0, 0)),           # fc1w
            pl.BlockSpec((1, 84), lambda b: (0, 0)),             # fc1b
            pl.BlockSpec((84, 10), lambda b: (0, 0)),            # fc2w
            pl.BlockSpec((1, 10), lambda b: (0, 0)),             # fc2b
        ],
        out_specs=pl.BlockSpec((1, 1, 10), lambda b: (b, 0, 0)),
        scratch_shapes=[pltpu.VMEM((14, 84), jnp.float32),       # pooled map 1
                        pltpu.VMEM((5, 80), jnp.float32)],       # pooled map 2
        compiler_params=pltpu.CompilerParams(
            dimension_semantics=("parallel",)),
    )(x_img, w1m, b1r, pr1, pc1, w2m, b2r, pr2, pc2, w3m, b3r,
      fc1w, fc1b, fc2w, fc2b)
    return out.reshape(B, 10)


# --------------------------------------------------------------------------
# Pure-JAX reference (mirrors the PyTorch module) for a correctness check
# --------------------------------------------------------------------------
def _ref_forward(x_nchw, params):
    def conv(x, w, b):
        y = jax.lax.conv_general_dilated(
            x, w, window_strides=(1, 1), padding="VALID",
            dimension_numbers=("NCHW", "OIHW", "NCHW"))
        return y + b[None, :, None, None]

    def pool(x):
        B, C, H, W = x.shape
        return x.reshape(B, C, H // 2, 2, W // 2, 2).mean(axis=(3, 5))

    x = jnp.tanh(conv(x_nchw, params["conv1_w"], params["conv1_b"]))
    x = jnp.tanh(pool(x))
    x = jnp.tanh(conv(x, params["conv2_w"], params["conv2_b"]))
    x = jnp.tanh(pool(x))
    x = jnp.tanh(conv(x, params["conv3_w"], params["conv3_b"]))
    x = x.reshape(x.shape[0], -1)
    x = jnp.tanh(x @ params["fc1_w"] + params["fc1_b"])
    x = jnp.tanh(x @ params["fc2_w"] + params["fc2_b"])
    return x


if __name__ == "__main__":
    key = jax.random.PRNGKey(0)
    kp, kx = jax.random.split(key)
    params = init_lenet_params(kp)
    # LeNet requires 32x32 single-channel inputs; batch = 2.
    x = jax.random.normal(kx, (2, 1, 32, 32), dtype=jnp.float32)

    out = jax.jit(lenet_forward)(x, params)
    out = jax.block_until_ready(out)
    assert out.shape == (2, 10), out.shape
    assert bool(jnp.all(jnp.isfinite(out)))

    ref = _ref_forward(x, params)
    assert bool(jnp.allclose(out, ref, atol=1e-4, rtol=1e-4)), (
        float(jnp.max(jnp.abs(out - ref))))
    print("KERNEL_OK")
</pallas_src>

<mosaic_0001>
module attributes {stable_mosaic.version = 11 : i64} {
  func.func @_lenet_kernel(%arg0: i32, %arg1: memref<1x32x32xf32, #tpu.memory_space<vmem>>, %arg2: memref<5x32x168xf32, #tpu.memory_space<vmem>>, %arg3: memref<1x168xf32, #tpu.memory_space<vmem>>, %arg4: memref<14x28xf32, #tpu.memory_space<vmem>>, %arg5: memref<168x84xf32, #tpu.memory_space<vmem>>, %arg6: memref<5x84x160xf32, #tpu.memory_space<vmem>>, %arg7: memref<1x160xf32, #tpu.memory_space<vmem>>, %arg8: memref<5x10xf32, #tpu.memory_space<vmem>>, %arg9: memref<160x80xf32, #tpu.memory_space<vmem>>, %arg10: memref<5x80x120xf32, #tpu.memory_space<vmem>>, %arg11: memref<1x120xf32, #tpu.memory_space<vmem>>, %arg12: memref<120x84xf32, #tpu.memory_space<vmem>>, %arg13: memref<1x84xf32, #tpu.memory_space<vmem>>, %arg14: memref<84x10xf32, #tpu.memory_space<vmem>>, %arg15: memref<1x10xf32, #tpu.memory_space<vmem>>, %arg16: memref<1x1x10xf32, #tpu.memory_space<vmem>>, %arg17: memref<14x84xf32, #tpu.memory_space<vmem>>, %arg18: memref<5x80xf32, #tpu.memory_space<vmem>>) attributes {dimension_semantics = [#tpu.dimension_semantics<parallel>], iteration_bounds = array<i64: 2>, scalar_prefetch = 0 : i64, scratch_operands = 2 : i64, tpu.core_type = #tpu.core_type<tc>, window_params = [{transform_indices = @transform_0, window_bounds = array<i64: 1, 32, 32>}, {pipeline_mode = #tpu.pipeline_mode<synchronous>, transform_indices = @transform_1, window_bounds = array<i64: 5, 32, 168>}, {pipeline_mode = #tpu.pipeline_mode<synchronous>, transform_indices = @transform_2, window_bounds = array<i64: 1, 168>}, {pipeline_mode = #tpu.pipeline_mode<synchronous>, transform_indices = @transform_3, window_bounds = array<i64: 14, 28>}, {pipeline_mode = #tpu.pipeline_mode<synchronous>, transform_indices = @transform_4, window_bounds = array<i64: 168, 84>}, {pipeline_mode = #tpu.pipeline_mode<synchronous>, transform_indices = @transform_5, window_bounds = array<i64: 5, 84, 160>}, {pipeline_mode = #tpu.pipeline_mode<synchronous>, transform_indices = @transform_6, window_bounds = array<i64: 1, 160>}, {pipeline_mode = #tpu.pipeline_mode<synchronous>, transform_indices = @transform_7, window_bounds = array<i64: 5, 10>}, {pipeline_mode = #tpu.pipeline_mode<synchronous>, transform_indices = @transform_8, window_bounds = array<i64: 160, 80>}, {pipeline_mode = #tpu.pipeline_mode<synchronous>, transform_indices = @transform_9, window_bounds = array<i64: 5, 80, 120>}, {pipeline_mode = #tpu.pipeline_mode<synchronous>, transform_indices = @transform_10, window_bounds = array<i64: 1, 120>}, {pipeline_mode = #tpu.pipeline_mode<synchronous>, transform_indices = @transform_11, window_bounds = array<i64: 120, 84>}, {pipeline_mode = #tpu.pipeline_mode<synchronous>, transform_indices = @transform_12, window_bounds = array<i64: 1, 84>}, {pipeline_mode = #tpu.pipeline_mode<synchronous>, transform_indices = @transform_13, window_bounds = array<i64: 84, 10>}, {pipeline_mode = #tpu.pipeline_mode<synchronous>, transform_indices = @transform_14, window_bounds = array<i64: 1, 10>}, {transform_indices = @transform_15, window_bounds = array<i64: 1, 1, 10>}]} {
    %cst = arith.constant 0.000000e+00 : f32
    %0 = vector.broadcast %cst : f32 to vector<28x168xf32>
    %c0 = arith.constant 0 : index
    %c0_0 = arith.constant 0 : index
    %c0_1 = arith.constant 0 : index
    %1 = vector.load %arg1[%c0, %c0_0, %c0_1] : memref<1x32x32xf32, #tpu.memory_space<vmem>>, vector<1x28x32xf32>
    %2 = vector.shape_cast %1 : vector<1x28x32xf32> to vector<28x32xf32>
    %c0_2 = arith.constant 0 : index
    %c0_3 = arith.constant 0 : index
    %c0_4 = arith.constant 0 : index
    %3 = vector.load %arg2[%c0_2, %c0_3, %c0_4] : memref<5x32x168xf32, #tpu.memory_space<vmem>>, vector<1x32x168xf32>
    %4 = vector.shape_cast %3 : vector<1x32x168xf32> to vector<32x168xf32>
    %cst_5 = arith.constant dense<0.000000e+00> : vector<28x168xf32>
    %5 = tpu.matmul %2, %4, %cst_5 {dimension_numbers = #tpu.dot_dimension_numbers<[1], [0], [0], [1], [0, 0, 1, 1], [], []>} : vector<28x32xf32>, vector<32x168xf32>, vector<28x168xf32> -> vector<28x168xf32>
    %6 = arith.addf %0, %5 : vector<28x168xf32>
    %c0_6 = arith.constant 0 : index
    %c1 = arith.constant 1 : index
    %c0_7 = arith.constant 0 : index
    %7 = vector.load %arg1[%c0_6, %c1, %c0_7] : memref<1x32x32xf32, #tpu.memory_space<vmem>>, vector<1x28x32xf32>
    %8 = vector.shape_cast %7 : vector<1x28x32xf32> to vector<28x32xf32>
    %c1_8 = arith.constant 1 : index
    %c0_9 = arith.constant 0 : index
    %c0_10 = arith.constant 0 : index
    %9 = vector.load %arg2[%c1_8, %c0_9, %c0_10] : memref<5x32x168xf32, #tpu.memory_space<vmem>>, vector<1x32x168xf32>
    %10 = vector.shape_cast %9 : vector<1x32x168xf32> to vector<32x168xf32>
    %cst_11 = arith.constant dense<0.000000e+00> : vector<28x168xf32>
    %11 = tpu.matmul %8, %10, %cst_11 {dimension_numbers = #tpu.dot_dimension_numbers<[1], [0], [0], [1], [0, 0, 1, 1], [], []>} : vector<28x32xf32>, vector<32x168xf32>, vector<28x168xf32> -> vector<28x168xf32>
    %12 = arith.addf %6, %11 : vector<28x168xf32>
    %c0_12 = arith.constant 0 : index
    %c2 = arith.constant 2 : index
    %c0_13 = arith.constant 0 : index
    %13 = vector.load %arg1[%c0_12, %c2, %c0_13] : memref<1x32x32xf32, #tpu.memory_space<vmem>>, vector<1x28x32xf32>
    %14 = vector.shape_cast %13 : vector<1x28x32xf32> to vector<28x32xf32>
    %c2_14 = arith.constant 2 : index
    %c0_15 = arith.constant 0 : index
    %c0_16 = arith.constant 0 : index
    %15 = vector.load %arg2[%c2_14, %c0_15, %c0_16] : memref<5x32x168xf32, #tpu.memory_space<vmem>>, vector<1x32x168xf32>
    %16 = vector.shape_cast %15 : vector<1x32x168xf32> to vector<32x168xf32>
    %cst_17 = arith.constant dense<0.000000e+00> : vector<28x168xf32>
    %17 = tpu.matmul %14, %16, %cst_17 {dimension_numbers = #tpu.dot_dimension_numbers<[1], [0], [0], [1], [0, 0, 1, 1], [], []>} : vector<28x32xf32>, vector<32x168xf32>, vector<28x168xf32> -> vector<28x168xf32>
    %18 = arith.addf %12, %17 : vector<28x168xf32>
    %c0_18 = arith.constant 0 : index
    %c3 = arith.constant 3 : index
    %c0_19 = arith.constant 0 : index
    %19 = vector.load %arg1[%c0_18, %c3, %c0_19] : memref<1x32x32xf32, #tpu.memory_space<vmem>>, vector<1x28x32xf32>
    %20 = vector.shape_cast %19 : vector<1x28x32xf32> to vector<28x32xf32>
    %c3_20 = arith.constant 3 : index
    %c0_21 = arith.constant 0 : index
    %c0_22 = arith.constant 0 : index
    %21 = vector.load %arg2[%c3_20, %c0_21, %c0_22] : memref<5x32x168xf32, #tpu.memory_space<vmem>>, vector<1x32x168xf32>
    %22 = vector.shape_cast %21 : vector<1x32x168xf32> to vector<32x168xf32>
    %cst_23 = arith.constant dense<0.000000e+00> : vector<28x168xf32>
    %23 = tpu.matmul %20, %22, %cst_23 {dimension_numbers = #tpu.dot_dimension_numbers<[1], [0], [0], [1], [0, 0, 1, 1], [], []>} : vector<28x32xf32>, vector<32x168xf32>, vector<28x168xf32> -> vector<28x168xf32>
    %24 = arith.addf %18, %23 : vector<28x168xf32>
    %c0_24 = arith.constant 0 : index
    %c4 = arith.constant 4 : index
    %c0_25 = arith.constant 0 : index
    %25 = vector.load %arg1[%c0_24, %c4, %c0_25] : memref<1x32x32xf32, #tpu.memory_space<vmem>>, vector<1x28x32xf32>
    %26 = vector.shape_cast %25 : vector<1x28x32xf32> to vector<28x32xf32>
    %c4_26 = arith.constant 4 : index
    %c0_27 = arith.constant 0 : index
    %c0_28 = arith.constant 0 : index
    %27 = vector.load %arg2[%c4_26, %c0_27, %c0_28] : memref<5x32x168xf32, #tpu.memory_space<vmem>>, vector<1x32x168xf32>
    %28 = vector.shape_cast %27 : vector<1x32x168xf32> to vector<32x168xf32>
    %cst_29 = arith.constant dense<0.000000e+00> : vector<28x168xf32>
    %29 = tpu.matmul %26, %28, %cst_29 {dimension_numbers = #tpu.dot_dimension_numbers<[1], [0], [0], [1], [0, 0, 1, 1], [], []>} : vector<28x32xf32>, vector<32x168xf32>, vector<28x168xf32> -> vector<28x168xf32>
    %30 = arith.addf %24, %29 : vector<28x168xf32>
    %c0_30 = arith.constant 0 : index
    %c0_31 = arith.constant 0 : index
    %31 = vector.load %arg3[%c0_30, %c0_31] : memref<1x168xf32, #tpu.memory_space<vmem>>, vector<1x168xf32>
    %32 = vector.broadcast %31 : vector<1x168xf32> to vector<28x168xf32>
    %33 = arith.addf %30, %32 : vector<28x168xf32>
    %34 = math.tanh %33 : vector<28x168xf32>
    %c0_32 = arith.constant 0 : index
    %c0_33 = arith.constant 0 : index
    %35 = vector.load %arg4[%c0_32, %c0_33] : memref<14x28xf32, #tpu.memory_space<vmem>>, vector<14x28xf32>
    %cst_34 = arith.constant dense<0.000000e+00> : vector<14x168xf32>
    %36 = tpu.matmul %35, %34, %cst_34 {dimension_numbers = #tpu.dot_dimension_numbers<[1], [0], [0], [1], [0, 0, 1, 1], [], []>} : vector<14x28xf32>, vector<28x168xf32>, vector<14x168xf32> -> vector<14x168xf32>
    %c0_35 = arith.constant 0 : index
    %c0_36 = arith.constant 0 : index
    %37 = vector.load %arg5[%c0_35, %c0_36] : memref<168x84xf32, #tpu.memory_space<vmem>>, vector<168x84xf32>
    %cst_37 = arith.constant dense<0.000000e+00> : vector<14x84xf32>
    %38 = tpu.matmul %36, %37, %cst_37 {dimension_numbers = #tpu.dot_dimension_numbers<[1], [0], [0], [1], [0, 0, 1, 1], [], []>} : vector<14x168xf32>, vector<168x84xf32>, vector<14x84xf32> -> vector<14x84xf32>
    %39 = math.tanh %38 : vector<14x84xf32>
    %c0_38 = arith.constant 0 : index
    %c0_39 = arith.constant 0 : index
    %40 = vector.load %arg17[%c0_38, %c0_39] : memref<14x84xf32, #tpu.memory_space<vmem>>, vector<14x84xf32>
    tpu.vector_store %arg17[%c0_38, %c0_39], %39 {strides = array<i32>} : memref<14x84xf32, #tpu.memory_space<vmem>>, vector<14x84xf32>,
    %cst_40 = arith.constant 0.000000e+00 : f32
    %41 = vector.broadcast %cst_40 : f32 to vector<10x160xf32>
    %c0_41 = arith.constant 0 : index
    %c0_42 = arith.constant 0 : index
    %42 = vector.load %arg17[%c0_41, %c0_42] : memref<14x84xf32, #tpu.memory_space<vmem>>, vector<10x84xf32>
    %c0_43 = arith.constant 0 : index
    %c0_44 = arith.constant 0 : index
    %c0_45 = arith.constant 0 : index
    %43 = vector.load %arg6[%c0_43, %c0_44, %c0_45] : memref<5x84x160xf32, #tpu.memory_space<vmem>>, vector<1x84x160xf32>
    %44 = vector.shape_cast %43 : vector<1x84x160xf32> to vector<84x160xf32>
    %cst_46 = arith.constant dense<0.000000e+00> : vector<10x160xf32>
    %45 = tpu.matmul %42, %44, %cst_46 {dimension_numbers = #tpu.dot_dimension_numbers<[1], [0], [0], [1], [0, 0, 1, 1], [], []>} : vector<10x84xf32>, vector<84x160xf32>, vector<10x160xf32> -> vector<10x160xf32>
    %46 = arith.addf %41, %45 : vector<10x160xf32>
    %c1_47 = arith.constant 1 : index
    %c0_48 = arith.constant 0 : index
    %47 = vector.load %arg17[%c1_47, %c0_48] : memref<14x84xf32, #tpu.memory_space<vmem>>, vector<10x84xf32>
    %c1_49 = arith.constant 1 : index
    %c0_50 = arith.constant 0 : index
    %c0_51 = arith.constant 0 : index
    %48 = vector.load %arg6[%c1_49, %c0_50, %c0_51] : memref<5x84x160xf32, #tpu.memory_space<vmem>>, vector<1x84x160xf32>
    %49 = vector.shape_cast %48 : vector<1x84x160xf32> to vector<84x160xf32>
    %cst_52 = arith.constant dense<0.000000e+00> : vector<10x160xf32>
    %50 = tpu.matmul %47, %49, %cst_52 {dimension_numbers = #tpu.dot_dimension_numbers<[1], [0], [0], [1], [0, 0, 1, 1], [], []>} : vector<10x84xf32>, vector<84x160xf32>, vector<10x160xf32> -> vector<10x160xf32>
    %51 = arith.addf %46, %50 : vector<10x160xf32>
    %c2_53 = arith.constant 2 : index
    %c0_54 = arith.constant 0 : index
    %52 = vector.load %arg17[%c2_53, %c0_54] : memref<14x84xf32, #tpu.memory_space<vmem>>, vector<10x84xf32>
    %c2_55 = arith.constant 2 : index
    %c0_56 = arith.constant 0 : index
    %c0_57 = arith.constant 0 : index
    %53 = vector.load %arg6[%c2_55, %c0_56, %c0_57] : memref<5x84x160xf32, #tpu.memory_space<vmem>>, vector<1x84x160xf32>
    %54 = vector.shape_cast %53 : vector<1x84x160xf32> to vector<84x160xf32>
    %cst_58 = arith.constant dense<0.000000e+00> : vector<10x160xf32>
    %55 = tpu.matmul %52, %54, %cst_58 {dimension_numbers = #tpu.dot_dimension_numbers<[1], [0], [0], [1], [0, 0, 1, 1], [], []>} : vector<10x84xf32>, vector<84x160xf32>, vector<10x160xf32> -> vector<10x160xf32>
    %56 = arith.addf %51, %55 : vector<10x160xf32>
    %c3_59 = arith.constant 3 : index
    %c0_60 = arith.constant 0 : index
    %57 = vector.load %arg17[%c3_59, %c0_60] : memref<14x84xf32, #tpu.memory_space<vmem>>, vector<10x84xf32>
    %c3_61 = arith.constant 3 : index
    %c0_62 = arith.constant 0 : index
    %c0_63 = arith.constant 0 : index
    %58 = vector.load %arg6[%c3_61, %c0_62, %c0_63] : memref<5x84x160xf32, #tpu.memory_space<vmem>>, vector<1x84x160xf32>
    %59 = vector.shape_cast %58 : vector<1x84x160xf32> to vector<84x160xf32>
    %cst_64 = arith.constant dense<0.000000e+00> : vector<10x160xf32>
    %60 = tpu.matmul %57, %59, %cst_64 {dimension_numbers = #tpu.dot_dimension_numbers<[1], [0], [0], [1], [0, 0, 1, 1], [], []>} : vector<10x84xf32>, vector<84x160xf32>, vector<10x160xf32> -> vector<10x160xf32>
    %61 = arith.addf %56, %60 : vector<10x160xf32>
    %c4_65 = arith.constant 4 : index
    %c0_66 = arith.constant 0 : index
    %62 = vector.load %arg17[%c4_65, %c0_66] : memref<14x84xf32, #tpu.memory_space<vmem>>, vector<10x84xf32>
    %c4_67 = arith.constant 4 : index
    %c0_68 = arith.constant 0 : index
    %c0_69 = arith.constant 0 : index
    %63 = vector.load %arg6[%c4_67, %c0_68, %c0_69] : memref<5x84x160xf32, #tpu.memory_space<vmem>>, vector<1x84x160xf32>
    %64 = vector.shape_cast %63 : vector<1x84x160xf32> to vector<84x160xf32>
    %cst_70 = arith.constant dense<0.000000e+00> : vector<10x160xf32>
    %65 = tpu.matmul %62, %64, %cst_70 {dimension_numbers = #tpu.dot_dimension_numbers<[1], [0], [0], [1], [0, 0, 1, 1], [], []>} : vector<10x84xf32>, vector<84x160xf32>, vector<10x160xf32> -> vector<10x160xf32>
    %66 = arith.addf %61, %65 : vector<10x160xf32>
    %c0_71 = arith.constant 0 : index
    %c0_72 = arith.constant 0 : index
    %67 = vector.load %arg7[%c0_71, %c0_72] : memref<1x160xf32, #tpu.memory_space<vmem>>, vector<1x160xf32>
    %68 = vector.broadcast %67 : vector<1x160xf32> to vector<10x160xf32>
    %69 = arith.addf %66, %68 : vector<10x160xf32>
    %70 = math.tanh %69 : vector<10x160xf32>
    %c0_73 = arith.constant 0 : index
    %c0_74 = arith.constant 0 : index
    %71 = vector.load %arg8[%c0_73, %c0_74] : memref<5x10xf32, #tpu.memory_space<vmem>>, vector<5x10xf32>
    %cst_75 = arith.constant dense<0.000000e+00> : vector<5x160xf32>
    %72 = tpu.matmul %71, %70, %cst_75 {dimension_numbers = #tpu.dot_dimension_numbers<[1], [0], [0], [1], [0, 0, 1, 1], [], []>} : vector<5x10xf32>, vector<10x160xf32>, vector<5x160xf32> -> vector<5x160xf32>
    %c0_76 = arith.constant 0 : index
    %c0_77 = arith.constant 0 : index
    %73 = vector.load %arg9[%c0_76, %c0_77] : memref<160x80xf32, #tpu.memory_space<vmem>>, vector<160x80xf32>
    %cst_78 = arith.constant dense<0.000000e+00> : vector<5x80xf32>
    %74 = tpu.matmul %72, %73, %cst_78 {dimension_numbers = #tpu.dot_dimension_numbers<[1], [0], [0], [1], [0, 0, 1, 1], [], []>} : vector<5x160xf32>, vector<160x80xf32>, vector<5x80xf32> -> vector<5x80xf32>
    %75 = math.tanh %74 : vector<5x80xf32>
    %c0_79 = arith.constant 0 : index
    %c0_80 = arith.constant 0 : index
    %76 = vector.load %arg18[%c0_79, %c0_80] : memref<5x80xf32, #tpu.memory_space<vmem>>, vector<5x80xf32>
    tpu.vector_store %arg18[%c0_79, %c0_80], %75 {strides = array<i32>} : memref<5x80xf32, #tpu.memory_space<vmem>>, vector<5x80xf32>,
    %cst_81 = arith.constant 0.000000e+00 : f32
    %77 = vector.broadcast %cst_81 : f32 to vector<1x120xf32>
    %c0_82 = arith.constant 0 : index
    %c0_83 = arith.constant 0 : index
    %78 = vector.load %arg18[%c0_82, %c0_83] : memref<5x80xf32, #tpu.memory_space<vmem>>, vector<1x80xf32>
    %c0_84 = arith.constant 0 : index
    %c0_85 = arith.constant 0 : index
    %c0_86 = arith.constant 0 : index
    %79 = vector.load %arg10[%c0_84, %c0_85, %c0_86] : memref<5x80x120xf32, #tpu.memory_space<vmem>>, vector<1x80x120xf32>
    %80 = vector.shape_cast %79 : vector<1x80x120xf32> to vector<80x120xf32>
    %cst_87 = arith.constant dense<0.000000e+00> : vector<1x120xf32>
    %81 = tpu.matmul %78, %80, %cst_87 {dimension_numbers = #tpu.dot_dimension_numbers<[1], [0], [0], [1], [0, 0, 1, 1], [], []>} : vector<1x80xf32>, vector<80x120xf32>, vector<1x120xf32> -> vector<1x120xf32>
    %82 = arith.addf %77, %81 : vector<1x120xf32>
    %c1_88 = arith.constant 1 : index
    %c0_89 = arith.constant 0 : index
    %83 = vector.load %arg18[%c1_88, %c0_89] : memref<5x80xf32, #tpu.memory_space<vmem>>, vector<1x80xf32>
    %c1_90 = arith.constant 1 : index
    %c0_91 = arith.constant 0 : index
    %c0_92 = arith.constant 0 : index
    %84 = vector.load %arg10[%c1_90, %c0_91, %c0_92] : memref<5x80x120xf32, #tpu.memory_space<vmem>>, vector<1x80x120xf32>
    %85 = vector.shape_cast %84 : vector<1x80x120xf32> to vector<80x120xf32>
    %cst_93 = arith.constant dense<0.000000e+00> : vector<1x120xf32>
    %86 = tpu.matmul %83, %85, %cst_93 {dimension_numbers = #tpu.dot_dimension_numbers<[1], [0], [0], [1], [0, 0, 1, 1], [], []>} : vector<1x80xf32>, vector<80x120xf32>, vector<1x120xf32> -> vector<1x120xf32>
    %87 = arith.addf %82, %86 : vector<1x120xf32>
    %c2_94 = arith.constant 2 : index
    %c0_95 = arith.constant 0 : index
    %88 = vector.load %arg18[%c2_94, %c0_95] : memref<5x80xf32, #tpu.memory_space<vmem>>, vector<1x80xf32>
    %c2_96 = arith.constant 2 : index
    %c0_97 = arith.constant 0 : index
    %c0_98 = arith.constant 0 : index
    %89 = vector.load %arg10[%c2_96, %c0_97, %c0_98] : memref<5x80x120xf32, #tpu.memory_space<vmem>>, vector<1x80x120xf32>
    %90 = vector.shape_cast %89 : vector<1x80x120xf32> to vector<80x120xf32>
    %cst_99 = arith.constant dense<0.000000e+00> : vector<1x120xf32>
    %91 = tpu.matmul %88, %90, %cst_99 {dimension_numbers = #tpu.dot_dimension_numbers<[1], [0], [0], [1], [0, 0, 1, 1], [], []>} : vector<1x80xf32>, vector<80x120xf32>, vector<1x120xf32> -> vector<1x120xf32>
    %92 = arith.addf %87, %91 : vector<1x120xf32>
    %c3_100 = arith.constant 3 : index
    %c0_101 = arith.constant 0 : index
    %93 = vector.load %arg18[%c3_100, %c0_101] : memref<5x80xf32, #tpu.memory_space<vmem>>, vector<1x80xf32>
    %c3_102 = arith.constant 3 : index
    %c0_103 = arith.constant 0 : index
    %c0_104 = arith.constant 0 : index
    %94 = vector.load %arg10[%c3_102, %c0_103, %c0_104] : memref<5x80x120xf32, #tpu.memory_space<vmem>>, vector<1x80x120xf32>
    %95 = vector.shape_cast %94 : vector<1x80x120xf32> to vector<80x120xf32>
    %cst_105 = arith.constant dense<0.000000e+00> : vector<1x120xf32>
    %96 = tpu.matmul %93, %95, %cst_105 {dimension_numbers = #tpu.dot_dimension_numbers<[1], [0], [0], [1], [0, 0, 1, 1], [], []>} : vector<1x80xf32>, vector<80x120xf32>, vector<1x120xf32> -> vector<1x120xf32>
    %97 = arith.addf %92, %96 : vector<1x120xf32>
    %c4_106 = arith.constant 4 : index
    %c0_107 = arith.constant 0 : index
    %98 = vector.load %arg18[%c4_106, %c0_107] : memref<5x80xf32, #tpu.memory_space<vmem>>, vector<1x80xf32>
    %c4_108 = arith.constant 4 : index
    %c0_109 = arith.constant 0 : index
    %c0_110 = arith.constant 0 : index
    %99 = vector.load %arg10[%c4_108, %c0_109, %c0_110] : memref<5x80x120xf32, #tpu.memory_space<vmem>>, vector<1x80x120xf32>
    %100 = vector.shape_cast %99 : vector<1x80x120xf32> to vector<80x120xf32>
    %cst_111 = arith.constant dense<0.000000e+00> : vector<1x120xf32>
    %101 = tpu.matmul %98, %100, %cst_111 {dimension_numbers = #tpu.dot_dimension_numbers<[1], [0], [0], [1], [0, 0, 1, 1], [], []>} : vector<1x80xf32>, vector<80x120xf32>, vector<1x120xf32> -> vector<1x120xf32>
    %102 = arith.addf %97, %101 : vector<1x120xf32>
    %c0_112 = arith.constant 0 : index
    %c0_113 = arith.constant 0 : index
    %103 = vector.load %arg11[%c0_112, %c0_113] : memref<1x120xf32, #tpu.memory_space<vmem>>, vector<1x120xf32>
    %104 = arith.addf %102, %103 : vector<1x120xf32>
    %105 = math.tanh %104 : vector<1x120xf32>
    %c0_114 = arith.constant 0 : index
    %c0_115 = arith.constant 0 : index
    %106 = vector.load %arg12[%c0_114, %c0_115] : memref<120x84xf32, #tpu.memory_space<vmem>>, vector<120x84xf32>
    %cst_116 = arith.constant dense<0.000000e+00> : vector<1x84xf32>
    %107 = tpu.matmul %105, %106, %cst_116 {dimension_numbers = #tpu.dot_dimension_numbers<[1], [0], [0], [1], [0, 0, 1, 1], [], []>} : vector<1x120xf32>, vector<120x84xf32>, vector<1x84xf32> -> vector<1x84xf32>
    %c0_117 = arith.constant 0 : index
    %c0_118 = arith.constant 0 : index
    %108 = vector.load %arg13[%c0_117, %c0_118] : memref<1x84xf32, #tpu.memory_space<vmem>>, vector<1x84xf32>
    %109 = arith.addf %107, %108 : vector<1x84xf32>
    %110 = math.tanh %109 : vector<1x84xf32>
    %c0_119 = arith.constant 0 : index
    %c0_120 = arith.constant 0 : index
    %111 = vector.load %arg14[%c0_119, %c0_120] : memref<84x10xf32, #tpu.memory_space<vmem>>, vector<84x10xf32>
    %cst_121 = arith.constant dense<0.000000e+00> : vector<1x10xf32>
    %112 = tpu.matmul %110, %111, %cst_121 {dimension_numbers = #tpu.dot_dimension_numbers<[1], [0], [0], [1], [0, 0, 1, 1], [], []>} : vector<1x84xf32>, vector<84x10xf32>, vector<1x10xf32> -> vector<1x10xf32>
    %c0_122 = arith.constant 0 : index
    %c0_123 = arith.constant 0 : index
    %113 = vector.load %arg15[%c0_122, %c0_123] : memref<1x10xf32, #tpu.memory_space<vmem>>, vector<1x10xf32>
    %114 = arith.addf %112, %113 : vector<1x10xf32>
    %115 = math.tanh %114 : vector<1x10xf32>
    %c0_124 = arith.constant 0 : index
    %c0_125 = arith.constant 0 : index
    %c0_126 = arith.constant 0 : index
    %116 = vector.load %arg16[%c0_124, %c0_125, %c0_126] : memref<1x1x10xf32, #tpu.memory_space<vmem>>, vector<1x1x10xf32>
    %117 = vector.shape_cast %116 : vector<1x1x10xf32> to vector<1x10xf32>
    %118 = vector.shape_cast %115 : vector<1x10xf32> to vector<1x1x10xf32>
    tpu.vector_store %arg16[%c0_124, %c0_125, %c0_126], %118 {strides = array<i32>} : memref<1x1x10xf32, #tpu.memory_space<vmem>>, vector<1x1x10xf32>,
    return
  }
  func.func @transform_0(%arg0: i32) -> (i32, i32, i32) {
    %c0_i32 = arith.constant 0 : i32
    %c0_i32_0 = arith.constant 0 : i32
    %c0_i32_1 = arith.constant 0 : i32
    return %arg0, %c0_i32, %c0_i32_0 : i32, i32, i32
  }
  func.func @transform_1(%arg0: i32) -> (i32, i32, i32) {
    %c0_i32 = arith.constant 0 : i32
    %c0_i32_0 = arith.constant 0 : i32
    %c0_i32_1 = arith.constant 0 : i32
    %c0_i32_2 = arith.constant 0 : i32
    return %c0_i32, %c0_i32_0, %c0_i32_1 : i32, i32, i32
  }
  func.func @transform_2(%arg0: i32) -> (i32, i32) {
    %c0_i32 = arith.constant 0 : i32
    %c0_i32_0 = arith.constant 0 : i32
    %c0_i32_1 = arith.constant 0 : i32
    return %c0_i32, %c0_i32_0 : i32, i32
  }
  func.func @transform_3(%arg0: i32) -> (i32, i32) {
    %c0_i32 = arith.constant 0 : i32
    %c0_i32_0 = arith.constant 0 : i32
    %c0_i32_1 = arith.constant 0 : i32
    return %c0_i32, %c0_i32_0 : i32, i32
  }
  func.func @transform_4(%arg0: i32) -> (i32, i32) {
    %c0_i32 = arith.constant 0 : i32
    %c0_i32_0 = arith.constant 0 : i32
    %c0_i32_1 = arith.constant 0 : i32
    return %c0_i32, %c0_i32_0 : i32, i32
  }
  func.func @transform_5(%arg0: i32) -> (i32, i32, i32) {
    %c0_i32 = arith.constant 0 : i32
    %c0_i32_0 = arith.constant 0 : i32
    %c0_i32_1 = arith.constant 0 : i32
    %c0_i32_2 = arith.constant 0 : i32
    return %c0_i32, %c0_i32_0, %c0_i32_1 : i32, i32, i32
  }
  func.func @transform_6(%arg0: i32) -> (i32, i32) {
    %c0_i32 = arith.constant 0 : i32
    %c0_i32_0 = arith.constant 0 : i32
    %c0_i32_1 = arith.constant 0 : i32
    return %c0_i32, %c0_i32_0 : i32, i32
  }
  func.func @transform_7(%arg0: i32) -> (i32, i32) {
    %c0_i32 = arith.constant 0 : i32
    %c0_i32_0 = arith.constant 0 : i32
    %c0_i32_1 = arith.constant 0 : i32
    return %c0_i32, %c0_i32_0 : i32, i32
  }
  func.func @transform_8(%arg0: i32) -> (i32, i32) {
    %c0_i32 = arith.constant 0 : i32
    %c0_i32_0 = arith.constant 0 : i32
    %c0_i32_1 = arith.constant 0 : i32
    return %c0_i32, %c0_i32_0 : i32, i32
  }
  func.func @transform_9(%arg0: i32) -> (i32, i32, i32) {
    %c0_i32 = arith.constant 0 : i32
    %c0_i32_0 = arith.constant 0 : i32
    %c0_i32_1 = arith.constant 0 : i32
    %c0_i32_2 = arith.constant 0 : i32
    return %c0_i32, %c0_i32_0, %c0_i32_1 : i32, i32, i32
  }
  func.func @transform_10(%arg0: i32) -> (i32, i32) {
    %c0_i32 = arith.constant 0 : i32
    %c0_i32_0 = arith.constant 0 : i32
    %c0_i32_1 = arith.constant 0 : i32
    return %c0_i32, %c0_i32_0 : i32, i32
  }
  func.func @transform_11(%arg0: i32) -> (i32, i32) {
    %c0_i32 = arith.constant 0 : i32
    %c0_i32_0 = arith.constant 0 : i32
    %c0_i32_1 = arith.constant 0 : i32
    return %c0_i32, %c0_i32_0 : i32, i32
  }
  func.func @transform_12(%arg0: i32) -> (i32, i32) {
    %c0_i32 = arith.constant 0 : i32
    %c0_i32_0 = arith.constant 0 : i32
    %c0_i32_1 = arith.constant 0 : i32
    return %c0_i32, %c0_i32_0 : i32, i32
  }
  func.func @transform_13(%arg0: i32) -> (i32, i32) {
    %c0_i32 = arith.constant 0 : i32
    %c0_i32_0 = arith.constant 0 : i32
    %c0_i32_1 = arith.constant 0 : i32
    return %c0_i32, %c0_i32_0 : i32, i32
  }
  func.func @transform_14(%arg0: i32) -> (i32, i32) {
    %c0_i32 = arith.constant 0 : i32
    %c0_i32_0 = arith.constant 0 : i32
    %c0_i32_1 = arith.constant 0 : i32
    return %c0_i32, %c0_i32_0 : i32, i32
  }
  func.func @transform_15(%arg0: i32) -> (i32, i32, i32) {
    %c0_i32 = arith.constant 0 : i32
    %c0_i32_0 = arith.constant 0 : i32
    %c0_i32_1 = arith.constant 0 : i32
    return %arg0, %c0_i32, %c0_i32_0 : i32, i32, i32
  }
}

</mosaic_0001>

<bundles_post_ra>
// kernel: tile.13
= control target key start
LH: loop header
LB: loop body
LE: loop exit
PB: predicated region body
PF: predicated region fallthrough
CT: control target
= control target key end

     0   :  { %s40_s0 = inlined_call_operand.vmem [shape: f32[6], index: 0, kind: input, shape index: {}]   ;;  %s41_s1 = inlined_call_operand.vmem [shape: f32[28,6], index: 1, kind: output, shape index: {}]  }
   0x1   :  { %v4_v0 = vld [vmem:[%s40_s0] ss:$0 sm:$0xff] }
   0x2   :  { %5 = vst [vmem:[%s41_s1] sm:$0xff] %v4_v0 }
   0x3   :  { %12 = vst [vmem:[%s41_s1 + $0x8] sm:$0xff] %v4_v0 }
   0x4   :  { %13 = vst [vmem:[%s41_s1 + $0x10] sm:$0xff] %v4_v0 }
   0x5   :  { %14 = vst [vmem:[%s41_s1 + $0x18] sm:$0xff] %v4_v0 }

// kernel: tile.14
= control target key start
LH: loop header
LB: loop body
LE: loop exit
PB: predicated region body
PF: predicated region fallthrough
CT: control target
= control target key end

     0   :  { %vm9_vm0 = vcmask 15360   ;;  %s248_s12 = smov 126   ;;  %s249_s13 = smov 114   ;;  %vm3_vm1 = vcmask 48128   ;;  %vm13_vm2 = vcmask 31744   ;;  %vm16_vm3 = vcmask 1048560   ;;  %s378_s0 = inlined_call_operand.vmem [shape: f32[28,6], index: 0, kind: input, shape index: {}]   ;;  %s379_s1 = inlined_call_operand.vmem [shape: f32[1,168], index: 1, kind: output, shape index: {}]  }
   0x1   :  { %v192_v0 = vld [vmem:[%s378_s0 + $0x15] sm:$0x1]   ;;  %v195_v3 = vld [vmem:[%s378_s0 + $0x13] sm:$0x1]   ;;  %v197_v4 = vld [vmem:[%s378_s0 + $0x11] sm:$0x1]  }
   0x2   :  { %v193_v1 = vld [vmem:[%s378_s0 + $0x15] sm:$0x1]   ;;  %26 = vrot.lane.b32.xlu1 %v195_v3, %s249_s13  ;;  %s250_s16 = smov 102   ;;  %v194_v5 = vld [vmem:[%s378_s0 + $0x14] sm:$0x1]   ;;  %s251_s21 = smov 120  }
   0x3   :  { %v10_v2 = vsel %vm9_vm0, %v193_v1, %v192_v0  ;;  %38 = vrot.lane.b32.xlu2 %v197_v4, %s250_s16  ;;  %v196_v6 = vld [vmem:[%s378_s0 + $0x12] sm:$0x1]   ;;  %s252_s22 = smov 108   ;;  %v198_v7 = vld [vmem:[%s378_s0 + $0x10] sm:$0x1]   ;;  %s253_s25 = smov 96  }
   0x4   :  { %11 = vrot.lane.b32.xlu0 %v10_v2, %s248_s12  ;;  %v199_v8 = vld [vmem:[%s378_s0 + $0xf] sm:$0x1]   ;;  %v200_v9 = vld [vmem:[%s378_s0 + $0xe] sm:$0x1]   ;;  %s254_s30 = smov 90   ;;  %s255_s2 = smov 84  }
   0x5   :  { %v201_v10 = vld [vmem:[%s378_s0 + $0xd] sm:$0x1]   ;;  %s256_s5 = smov 78   ;;  %v202_v11 = vld [vmem:[%s378_s0 + $0xc] sm:$0x1]   ;;  %s257_s10 = smov 72  }
   0x6   :  { %v203_v12 = vld [vmem:[%s378_s0 + $0xb] sm:$0x1]   ;;  %s258_s11 = smov 66   ;;  %v204_v13 = vld [vmem:[%s378_s0 + $0xa] sm:$0x1]   ;;  %s259_s14 = smov 60  }
   0x7   :  { %v205_v14 = vld [vmem:[%s378_s0 + $0x9] sm:$0x1]   ;;  %v206_v15 = vld [vmem:[%s378_s0 + $0x8] sm:$0x1]   ;;  %s260_s19 = smov 54   ;;  %s261_s20 = smov 48  }
   0x8   :  { %v207_v16 = vld [vmem:[%s378_s0 + $0x7] sm:$0x1]   ;;  %s262_s23 = smov 42   ;;  %v208_v17 = vld [vmem:[%s378_s0 + $0x6] sm:$0x1]   ;;  %s263_s28 = smov 36  }
   0x9   :  { %v209_v18 = vld [vmem:[%s378_s0 + $0x1b] sm:$0x1]   ;;  %s264_s29 = smov 34   ;;  %v210_v19 = vld [vmem:[%s378_s0 + $0x5] sm:$0x1]   ;;  %s265_s3 = smov 30  }
   0xa   :  { %32 = vrot.lane.b32.xlu1 %v196_v6, %s252_s22  ;;  %v211_v20 = vld [vmem:[%s378_s0 + $0x1a] sm:$0x1]   ;;  %v212_v21 = vld [vmem:[%s378_s0 + $0x4] sm:$0x1]   ;;  %s266_s8 = smov 28   ;;  %s267_s9 = smov 24  }
   0xb   :  { %44 = vrot.lane.b32.xlu2 %v198_v7, %s253_s25  ;;  %v213_v22 = vld [vmem:[%s378_s0 + $0x19] sm:$0x1]   ;;  %s268_s12 = smov 22   ;;  %v214_v23 = vld [vmem:[%s378_s0 + $0x3] sm:$0x1]   ;;  %s269_s17 = smov 18  }
   0xc   :  { %20 = vrot.lane.b32.xlu0 %v194_v5, %s251_s21  ;;  %v215_v24 = vld [vmem:[%s378_s0 + $0x18] sm:$0x1]   ;;  %s270_s18 = smov 16   ;;  %v216_v25 = vld [vmem:[%s378_s0 + $0x2] sm:$0x1]   ;;  %s271_s21 = smov 12  }
   0xd   :  { %v217_v26 = vld [vmem:[%s378_s0 + $0x17] sm:$0x1]   ;;  %v218_v27 = vld [vmem:[%s378_s0 + $0x1] sm:$0x1]   ;;  %s272_s26 = smov 10   ;;  %s273_s27 = smov 6  }
   0xe   :  { %v219_v28 = vld [vmem:[%s378_s0 + $0x16] sm:$0x1]   ;;  %v2_v29 = vld [vmem:[%s378_s0] sm:$0x1]   ;;  %vm22_vm4 = vcmask 1032128   ;;  %vm28_vm5 = vcmask 982928  }
   0xf   :  { %4 = vst.msk [vmem:[#allocation0] sm:$0x1] %vm3_vm1, %v2_v29   ;;  %vm34_vm6 = vcmask 933728   ;;  %vm40_vm7 = vcmask 884528   ;;  %vm46_vm8 = vcmask 835328   ;;  %vm52_vm9 = vcmask 786128  }
  0x10   :  { %vm58_vm10 = vcmask 736928   ;;  %vm64_vm11 = vcmask 687728   ;;  %vm70_vm12 = vcmask 638528   ;;  %vm76_vm13 = vcmask 589328  }
  0x11   :  { %vm82_vm14 = vcmask 540128   ;;  %vm88_vm15 = vcmask 490928   ;;  %vm94_vm0 = vcmask 441728   ;;  %vm100_vm1 = vcmask 392528  }
  0x12   :  { %56 = vrot.lane.b32.xlu1 %v200_v9, %s255_s2 }
  0x13   :  { %62 = vrot.lane.b32.xlu2 %v201_v10, %s256_s5 }
  0x14   :  { %50 = vrot.lane.b32.xlu0 %v199_v8, %s254_s30  ;;  %s274_s30 = smov 4  }
  0x1a   :  { %74 = vrot.lane.b32.xlu1 %v203_v12, %s258_s11 }
  0x1b   :  { %80 = vrot.lane.b32.xlu2 %v204_v13, %s259_s14 }
  0x1c   :  { %68 = vrot.lane.b32.xlu0 %v202_v11, %s257_s10 }
  0x22   :  { %92 = vrot.lane.b32.xlu1 %v206_v15, %s261_s20 }
  0x23   :  { %98 = vrot.lane.b32.xlu2 %v207_v16, %s262_s23 }
  0x24   :  { %86 = vrot.lane.b32.xlu0 %v205_v14, %s260_s19 }
  0x2a   :  { %110 = vrot.lane.b32.xlu1 %v209_v18, %s264_s29 }
  0x2b   :  { %117 = vrot.lane.b32.xlu2 %v210_v19, %s265_s3 }
  0x2c   :  { %104 = vrot.lane.b32.xlu0 %v208_v17, %s263_s28 }
  0x32   :  { %130 = vrot.lane.b32.xlu1 %v212_v21, %s267_s9 }
  0x33   :  { %136 = vrot.lane.b32.xlu2 %v213_v22, %s268_s12 }
  0x34   :  { %123 = vrot.lane.b32.xlu0 %v211_v20, %s266_s8 }
  0x3a   :  { %149 = vrot.lane.b32.xlu1 %v215_v24, %s270_s18 }
  0x3b   :  { %156 = vrot.lane.b32.xlu2 %v216_v25, %s271_s21 }
  0x3c   :  { %143 = vrot.lane.b32.xlu0 %v214_v23, %s269_s17 }
  0x42   :  { %169 = vrot.lane.b32.xlu1 %v218_v27, %s273_s27 }
  0x43   :  { %175 = vrot.lane.b32.xlu2 %v219_v28, %s274_s30 }
  0x44   :  { %162 = vrot.lane.b32.xlu0 %v217_v26, %s272_s26 }
  0x5d   :  { %v39_v30 = vpop.permute.xlu2 %38  }
  0x65   :  { %v45_v31 = vpop.permute.xlu2 %44  }
  0x6d   :  { %v63_v32 = vpop.permute.xlu2 %62  }
  0x74   :  { %v27_v34 = vpop.permute.xlu1 %26  }
  0x75   :  { %v81_v35 = vpop.permute.xlu2 %80  }
  0x76   :  { %v12_v33 = vpop.permute.xlu0 %11  }
  0x77   :  { %15 = vst.msk [vmem:[#allocation0 + $0x8] sm:$0x1] %vm13_vm2, %v12_v33   ;;  %vm106_vm2 = vcmask 343328  }
  0x78   :  { %17 = vst.msk [vmem:[#allocation0] sm:$0x1] %vm16_vm3, %v12_v33   ;;  %vm119_vm3 = vcmask 294128  }
  0x7c   :  { %v33_v37 = vpop.permute.xlu1 %32  }
  0x7d   :  { %v99_v38 = vpop.permute.xlu2 %98  }
  0x7e   :  { %v21_v36 = vpop.permute.xlu0 %20  }
  0x7f   :  { %23 = vst.msk [vmem:[#allocation0] sm:$0x1] %vm22_vm4, %v21_v36   ;;  %vm112_vm4 = vcmask 326928  }
  0x80   :  { %29 = vst.msk [vmem:[#allocation0] sm:$0x1] %vm28_vm5, %v27_v34   ;;  %vm125_vm5 = vcmask 277728  }
  0x81   :  { %35 = vst.msk [vmem:[#allocation0] sm:$0x1] %vm34_vm6, %v33_v37   ;;  %vm138_vm6 = vcmask 228528  }
  0x82   :  { %41 = vst.msk [vmem:[#allocation0] sm:$0x1] %vm40_vm7, %v39_v30   ;;  %vm132_vm7 = vcmask 244928  }
  0x83   :  { %47 = vst.msk [vmem:[#allocation0] sm:$0x1] %vm46_vm8, %v45_v31   ;;  %vm145_vm8 = vcmask 195728  }
  0x84   :  { %v57_v40 = vpop.permute.xlu1 %56  }
  0x85   :  { %v118_v41 = vpop.permute.xlu2 %117  }
  0x86   :  { %v51_v39 = vpop.permute.xlu0 %50  }
  0x87   :  { %53 = vst.msk [vmem:[#allocation0] sm:$0x1] %vm52_vm9, %v51_v39   ;;  %vm158_vm9 = vcmask 146528  }
  0x88   :  { %59 = vst.msk [vmem:[#allocation0] sm:$0x1] %vm58_vm10, %v57_v40   ;;  %vm151_vm10 = vcmask 179328  }
  0x89   :  { %65 = vst.msk [vmem:[#allocation0] sm:$0x1] %vm64_vm11, %v63_v32   ;;  %vm164_vm11 = vcmask 130128  }
  0x8c   :  { %v75_v43 = vpop.permute.xlu1 %74  }
  0x8d   :  { %v137_v44 = vpop.permute.xlu2 %136  }
  0x8e   :  { %v69_v42 = vpop.permute.xlu0 %68  }
  0x8f   :  { %71 = vst.msk [vmem:[#allocation0] sm:$0x1] %vm70_vm12, %v69_v42   ;;  %vm177_vm12 = vcmask 80928  }
  0x90   :  { %77 = vst.msk [vmem:[#allocation0] sm:$0x1] %vm76_vm13, %v75_v43   ;;  %vm171_vm13 = vcmask 97328  }
  0x91   :  { %83 = vst.msk [vmem:[#allocation0] sm:$0x1] %vm82_vm14, %v81_v35  }
  0x94   :  { %v93_v46 = vpop.permute.xlu1 %92  }
  0x95   :  { %v157_v47 = vpop.permute.xlu2 %156  }
  0x96   :  { %v87_v45 = vpop.permute.xlu0 %86  }
  0x97   :  { %89 = vst.msk [vmem:[#allocation0] sm:$0x1] %vm88_vm15, %v87_v45  }
  0x98   :  { %95 = vst.msk [vmem:[#allocation0] sm:$0x1] %vm94_vm0, %v93_v46  }
  0x99   :  { %101 = vst.msk [vmem:[#allocation0] sm:$0x1] %vm100_vm1, %v99_v38  }
  0x9c   :  { %v111_v49 = vpop.permute.xlu1 %110  }
  0x9d   :  { %114 = vst.msk [vmem:[#allocation0 + $0x8] sm:$0x1] %vm112_vm4, %v111_v49   ;;  %v176_v50 = vpop.permute.xlu2 %175  }
  0x9e   :  { %v105_v48 = vpop.permute.xlu0 %104  }
  0x9f   :  { %107 = vst.msk [vmem:[#allocation0] sm:$0x1] %vm106_vm2, %v105_v48  }
  0xa0   :  { %120 = vst.msk [vmem:[#allocation0] sm:$0x1] %vm119_vm3, %v118_v41  }
  0xa4   :  { %v131_v52 = vpop.permute.xlu1 %130  }
  0xa5   :  { %133 = vst.msk [vmem:[#allocation0] sm:$0x1] %vm132_vm7, %v131_v52  }
  0xa6   :  { %v124_v51 = vpop.permute.xlu0 %123  }
  0xa7   :  { %127 = vst.msk [vmem:[#allocation0 + $0x8] sm:$0x1] %vm125_vm5, %v124_v51  }
  0xa8   :  { %140 = vst.msk [vmem:[#allocation0 + $0x8] sm:$0x1] %vm138_vm6, %v137_v44  }
  0xac   :  { %v150_v54 = vpop.permute.xlu1 %149  }
  0xad   :  { %153 = vst.msk [vmem:[#allocation0 + $0x8] sm:$0x1] %vm151_vm10, %v150_v54  }
  0xae   :  { %v144_v53 = vpop.permute.xlu0 %143  }
  0xaf   :  { %146 = vst.msk [vmem:[#allocation0] sm:$0x1] %vm145_vm8, %v144_v53  }
  0xb0   :  { %159 = vst.msk [vmem:[#allocation0] sm:$0x1] %vm158_vm9, %v157_v47  }
  0xb4   :  { %v170_v56 = vpop.permute.xlu1 %169  }
  0xb5   :  { %172 = vst.msk [vmem:[#allocation0] sm:$0x1] %vm171_vm13, %v170_v56  }
  0xb6   :  { %v163_v55 = vpop.permute.xlu0 %162  }
  0xb7   :  { %166 = vst.msk [vmem:[#allocation0 + $0x8] sm:$0x1] %vm164_vm11, %v163_v55  }
  0xb8   :  { %179 = vst.msk [vmem:[#allocation0 + $0x8] sm:$0x1] %vm177_vm12, %v176_v50  }
  0xbc   :  { %v182_v58 = vld [vmem:[#allocation0] sm:$0x1] }
  0xbd   :  { %185 = vst [vmem:[%s379_s1] sm:$0x1] %v182_v58 }
  0xbf   :  { %v187_v57 = vld [vmem:[#allocation0 + $0x8] sm:$0x1] }
  0xc0   :  { %220 = vst [vmem:[%s379_s1 + $0x1] sm:$0x1] %v187_v57 }

// kernel: tile.18
= control target key start
LH: loop header
LB: loop body
LE: loop exit
PB: predicated region body
PF: predicated region fallthrough
CT: control target
= control target key end

     0   :  { %s28_s0 = inlined_call_operand.vmem [shape: f32[16], index: 0, kind: input, shape index: {}]   ;;  %s29_s1 = inlined_call_operand.vmem [shape: f32[10,16], index: 1, kind: output, shape index: {}]  }
   0x1   :  { %v4_v0 = vld [vmem:[%s28_s0] ss:$0 sm:$0xff] }
   0x2   :  { %5 = vst [vmem:[%s29_s1] sm:$0xff] %v4_v0 }
   0x3   :  { %8 = vst [vmem:[%s29_s1 + $0x8] sm:$0xff] %v4_v0 }

// kernel: tile.19
= control target key start
LH: loop header
LB: loop body
LE: loop exit
PB: predicated region body
PF: predicated region fallthrough
CT: control target
= control target key end

     0   :  { %s76_s10 = smov 112   ;;  %s77_s11 = smov 80   ;;  %vm4_vm0 = vcmask 130048   ;;  %vm10_vm1 = vcmask 1048448   ;;  %vm16_vm2 = vcmask 917248   ;;  %vm22_vm3 = vcmask 786048   ;;  %s123_s0 = inlined_call_operand.vmem [shape: f32[10,16], index: 0, kind: input, shape index: {}]   ;;  %s124_s1 = inlined_call_operand.vmem [shape: f32[1,160], index: 1, kind: output, shape index: {}]  }
   0x1   :  { %v61_v0 = vld [vmem:[%s123_s0 + $0x7] sm:$0x1]   ;;  %v63_v1 = vld [vmem:[%s123_s0 + $0x5] sm:$0x1]   ;;  %v65_v2 = vld [vmem:[%s123_s0 + $0x3] sm:$0x1]  }
   0x2   :  { %8 = vrot.lane.b32.xlu0 %v61_v0, %s76_s10  ;;  %20 = vrot.lane.b32.xlu1 %v63_v1, %s77_s11  ;;  %s78_s14 = smov 48   ;;  %v62_v3 = vld [vmem:[%s123_s0 + $0x6] sm:$0x1]   ;;  %v64_v4 = vld [vmem:[%s123_s0 + $0x4] sm:$0x1]   ;;  %s79_s19 = smov 96  }
   0x3   :  { %32 = vrot.lane.b32.xlu2 %v65_v2, %s78_s14  ;;  %s80_s20 = smov 64   ;;  %v66_v5 = vld [vmem:[%s123_s0 + $0x2] sm:$0x1]   ;;  %s43_s23 = smov 3  ;;  %vm28_vm4 = vcmask 654848   ;;  %vm34_vm5 = vcmask 523648  }
   0x4   :  { %s81_s24 = smov 32   ;;  %v67_v6 = vld [vmem:[%s123_s0 + $0x1] ss:$8 sm:%s43_s23]   ;;  %s82_s27 = smov 16   ;;  %vm40_vm6 = vcmask 392448   ;;  %vm47_vm7 = vcmask 261248  }
   0x5   :  { %s2_s28 = smov 3 }
   0x6   :  { %v3_v7 = vld [vmem:[%s123_s0] ss:$8 sm:%s2_s28]  }
   0x7   :  { %5 = vst.msk [vmem:[#allocation0] ss:$8 sm:$0x3] %vm4_vm0, %v3_v7  }
   0xa   :  { %14 = vrot.lane.b32.xlu0 %v62_v3, %s79_s19  ;;  %26 = vrot.lane.b32.xlu1 %v64_v4, %s80_s20 }
   0xb   :  { %38 = vrot.lane.b32.xlu2 %v66_v5, %s81_s24 }
  0x12   :  { %45 = vrot.lane.b32.xlu0 %v67_v6, %s82_s27 }
  0x5d   :  { %v33_v8 = vpop.permute.xlu2 %32  }
  0x65   :  { %v39_v9 = vpop.permute.xlu2 %38  }
  0x74   :  { %v9_v10 = vpop.permute.xlu0 %8   ;;  %v21_v11 = vpop.permute.xlu1 %20  }
  0x75   :  { %11 = vst.msk [vmem:[#allocation0] sm:$0x1] %vm10_vm1, %v9_v10  }
  0x7c   :  { %v15_v12 = vpop.permute.xlu0 %14   ;;  %v27_v13 = vpop.permute.xlu1 %26  }
  0x7d   :  { %17 = vst.msk [vmem:[#allocation0] sm:$0x1] %vm16_vm2, %v15_v12  }
  0x7e   :  { %23 = vst.msk [vmem:[#allocation0] sm:$0x1] %vm22_vm3, %v21_v11  }
  0x7f   :  { %29 = vst.msk [vmem:[#allocation0] sm:$0x1] %vm28_vm4, %v27_v13  }
  0x80   :  { %35 = vst.msk [vmem:[#allocation0] sm:$0x1] %vm34_vm5, %v33_v8  }
  0x81   :  { %41 = vst.msk [vmem:[#allocation0] sm:$0x1] %vm40_vm6, %v39_v9  }
  0x84   :  { %v46_v14 = vpop.permute.xlu0 %45  }
  0x85   :  { %48 = vst.msk [vmem:[#allocation0] ss:$8 sm:$0x3] %vm47_vm7, %v46_v14  }
  0x8c   :  { %v51_v15 = vld [vmem:[#allocation0] sm:$0x1]  ;;  %v56_v16 = vld [vmem:[#allocation0 + $0x8] sm:$0x1] }
  0x8d   :  { %54 = vst [vmem:[%s124_s1] sm:$0x1] %v51_v15 }
  0x8e   :  { %68 = vst [vmem:[%s124_s1 + $0x1] sm:$0x1] %v56_v16 }

// kernel: lenet_forward.1
= control target key start
LH: loop header
LB: loop body
LE: loop exit
PB: predicated region body
PF: predicated region fallthrough
CT: control target
= control target key end

     0   :  { %s3494_s0 = inlined_call_operand.vmem [shape: f32[2,32,32], index: 0, kind: input, shape index: {}]   ;;  %s3495_s1 = inlined_call_operand.vmem [shape: f32[5,32,168], index: 1, kind: input, shape index: {}]   ;;  %s3496_s2 = inlined_call_operand.vmem [shape: f32[1,168], index: 2, kind: input, shape index: {}]   ;;  %s3497_s3 = inlined_call_operand.vmem [shape: f32[14,28], index: 3, kind: input, shape index: {}]   ;;  %s3498_s4 = inlined_call_operand.vmem [shape: f32[168,84], index: 4, kind: input, shape index: {}]   ;;  %s3499_s5 = inlined_call_operand.vmem [shape: f32[5,84,160], index: 5, kind: input, shape index: {}]   ;;  %s3500_s6 = inlined_call_operand.vmem [shape: f32[1,160], index: 6, kind: input, shape index: {}]   ;;  %s3501_s7 = inlined_call_operand.vmem [shape: f32[5,10], index: 7, kind: input, shape index: {}]   ;;  %s3502_s8 = inlined_call_operand.vmem [shape: f32[160,80], index: 8, kind: input, shape index: {}]   ;;  %s3503_s9 = inlined_call_operand.vmem [shape: f32[5,80,120], index: 9, kind: input, shape index: {}]   ;;  %s3504_s10 = inlined_call_operand.vmem [shape: f32[1,120], index: 10, kind: input, shape index: {}]   ;;  %s3505_s11 = inlined_call_operand.vmem [shape: f32[120,84], index: 11, kind: input, shape index: {}]   ;;  %s3506_s12 = inlined_call_operand.vmem [shape: f32[1,84], index: 12, kind: input, shape index: {}]   ;;  %s3507_s13 = inlined_call_operand.vmem [shape: f32[84,10], index: 13, kind: input, shape index: {}]   ;;  %s3508_s14 = inlined_call_operand.vmem [shape: f32[1,10], index: 14, kind: input, shape index: {}]   ;;  %s3509_s15 = inlined_call_operand.hbm [shape: f32[2,1,10], index: 15, kind: output, shape index: {}]  }
   0x1   :  { %3516 = sst [smem:[#allocation13_spill]] %s3494_s0 }
   0x2   :  { %20 = vsyncpa [#allocation5], 0 }
   0x3   :  { %22 = vsyncpa [#allocation5 + $0x1], 0  ;;  %s2467_s18 = smov 0   ;;  %s2469_s19 = smov 0  }
   0x4   :  { %s2471_s20 = smov 0   ;;  %s2473_s21 = smov 0  }
   0x5 LB: > { %3517 = sst [smem:[#allocation7_spill]] %s2373_s18  ;;  %s2488_s22 = sadd.s32 4294967295, %s2385_s21   ;;  %s2385_s21 = sphi %s2473_s21, %s3529_s21   ;;  %s2381_s20 = sphi %s2471_s20, %s3531_s20   ;;  %s2377_s19 = sphi %s2469_s19, %s3533_s19   ;;  %s2373_s18 = sphi %s2467_s18, %s3532_s18  }
   0x6   : > { %3518 = sst [smem:[#allocation8_spill]] %s2381_s20  ;;  %s1984_s23 = sadd.s32 4294967294, %s2385_s21  }
   0x7   : > { %3519 = sst [smem:[#allocation9_spill]] %s2385_s21  ;;  %s2492_s24 = sadd.s32 1, %s2385_s21  }
   0x8   : > { %3520 = sst [smem:[#allocation10_spill]] %s2492_s24  ;;  %s355_s25 = sadd.s32 1, %s2381_s20 }
   0x9   : > { %s352_s26 = ssub.s32 %s2385_s21, %s2492_s24  ;;  %p365_p0 = scmp.ne.s32.totalorder %s2381_s20, %s2377_s19 }
   0xa   : > { %p353_p1 = scmp.eq.s32.totalorder %s352_s26, 0  ;;  %p366_p2 = scmp.eq.s32.totalorder %s2488_s22, 1 }
   0xb   : > { %p371_p3 = scmp.ne.s32.totalorder %s2377_s19, %s2373_s18  ;;  %p372_p4 = scmp.eq.s32.totalorder %s1984_s23, 1 }
   0xc   : > { %s2503_s27 = scalar_select %p353_p1, %s2381_s20, %s355_s25  }
   0xd   : > { %p2505_p5 = por %p366_p2, %p365_p0  ;;  %p2509_p6 = por %p372_p4, %p371_p3 }
   0xe   : > { %3521 = sst [smem:[#allocation11_spill]] %s2503_s27  ;;  %p1987_p7 = scmp.ge.s32.totalorder %s2385_s21, 1 }
   0xf   : > { %s3523_s29 = scalar_select %p2509_p6, 1, 0 }
  0x10   : > { %p440_p8 = scmp.lt.s32.totalorder %s2385_s21, 3 }
  0x11   : > { %3524 = sst [smem:[#allocation12_spill]] %s3523_s29 }
  0x12   : > { %p441_p9 = pnand %p1987_p7, %p440_p8 }
  0x13   : > { %p487_p10 = scmp.lt.s32.totalorder (!%p441_p9), %s2488_s22, 1  ;;  %s3525_s0 = sld [smem:[#allocation13_spill]] (!%p441_p9) }
  0x14   : > { %444 = sbr.rel (%p441_p9) target bundleno = 1462 (0x5b6), region = 80  ;;  %s485_s24 = sand.u32 (!%p441_p9), 1, %s2377_s19  }
  0x15   : > { %s1925_s16 = scalar_lea.hbm (!%p441_p9), %s3509_s15, %s2488_s22  ;;  %s486_s21 = scalar_lea.vmem (!%p441_p9), [#allocation4], %s485_s24 }
  0x16   : > { %s1927_s17 = sshll.u32 (!%p441_p9), %s486_s21, 4  ;;  %s1929_s23 = sshll.u32 (!%p441_p9), %s1925_s16, 4  ;;  %s1928_s17 = int_to_ptr.vmem [resolvable:$true] %s1927_s17  ;;  %s1930_s23 = int_to_ptr.hbm [resolvable:$true] %s1929_s23 }
  0x17   : > { %s1917_s25 = scalar_lea.sflag (!%p441_p9), [#allocation5], %s485_s24  ;;  %s2337_s18 = sshra.s32 (!%p441_p9), %s1930_s23, 4  ;;  %s2338_s18 = int_to_ptr.hbm [resolvable:$true] %s2337_s18 }
  0x18   : > { %p2344_p0 = scmp.lt.s32.totalorder (!%p441_p9), %s2338_s18, %s3509_s15 }
  0x19   : > { %v1996_v0 = vld [vmem:[%s3495_s1 + $0x70] sm:$0xff]  ;;  %v1997_v1 = vld [vmem:[%s3495_s1 + $0x78] sm:$0xff]  ;;  %v1994_v3 = vld [vmem:[%s3495_s1 + $0x60] sm:$0xff]  ;;  %s488_s27 = scalar_select %p487_p10, %s2488_s22, 1  ;;  %vm517_vm0 = vcmask 261120   ;;  %vm962_vm1 = vcmask 1043456  }
  0x1a   : > { %v503_v2 = vld [vmem:[%s3495_s1 + $0x38] sm:$0xff]  ;;  %542 = vmatpush.msra.mxu0 %v1996_v0  ;;  %571 = vmatpush.msra.mxu1 %v1997_v1  ;;  %v1995_v4 = vld [vmem:[%s3495_s1 + $0x68] sm:$0xff]  ;;  %v1992_v6 = vld [vmem:[%s3495_s1 + $0x50] sm:$0xff]  ;;  %vm955_vm2 = vcmask 228352   ;;  %vm1036_vm3 = vcmask 326656   ;;  %vm1091_vm4 = vcmask 687104  }
  0x1b   : > { %v501_v5 = vld [vmem:[%s3495_s1 + $0x28] sm:$0xff]  ;;  %641 = vmatpush.msra.mxu3 %v503_v2  ;;  %v1993_v7 = vld [vmem:[%s3495_s1 + $0x58] sm:$0xff]  ;;  %v502_v8 = vld [vmem:[%s3495_s1 + $0x30] sm:$0xff]  ;;  %s2243_s26 = sshll.u32 %s488_s27, 5  ;;  %vm1093_vm5 = vcmask 685056   ;;  %vm1540_vm6 = vcmask 1041408  }
  0x1c   : > { %543 = vmatpush.msra.mxu0 %v1994_v3  ;;  %572 = vmatpush.msra.mxu1 %v1995_v4  ;;  %v499_v9 = vld [vmem:[%s3495_s1 + $0x18] sm:$0xff]  ;;  %v1990_v10 = vld [vmem:[%s3495_s1 + $0x40] sm:$0xff]  ;;  %v1991_v11 = vld [vmem:[%s3495_s1 + $0x48] sm:$0xff]  ;;  %s2562_s29 = scalar_lea.vmem %s3525_s0, %s2243_s26  ;;  %vm1536_vm7 = vcmask 80896   ;;  %vm1651_vm8 = vcmask 651264   ;;  %vm1676_vm9 = vcmask 654336  }
  0x1d   : > { %642 = vmatpush.msra.mxu3 %v501_v5  ;;  %2244 = vmatpush.msra.mxu2 %v502_v8  ;;  %v500_v12 = vld [vmem:[%s3495_s1 + $0x20] sm:$0xff]  ;;  %v497_v13 = vld [vmem:[%s3495_s1 + $0x8] sm:$0xff]  ;;  %v498_v16 = vld [vmem:[%s3495_s1 + $0x10] sm:$0xff]  ;;  %vm1850_vm10 = vcmask 982016   ;;  %vm1914_vm11 = vcmask 73728   ;;  %s2339_s26 = scalar_lea.hbm %s2338_s18, 1 }
  0x1e   : > { %544 = vmatpush.msra.mxu0 %v1992_v6  ;;  %573 = vmatpush.msra.mxu1 %v1993_v7  ;;  %v504_v14 = vld [vmem:[%s2562_s29 + $0x1] sm:$0xff]  ;;  %v2020_v17 = vld [vmem:[%s3495_s1 + $0xb0] sm:$0xff]  ;;  %v2037_v21 = vld [vmem:[%s3495_s1 + $0xf8] sm:$0xff]  ;;  %p2340_p11 = scmp.ne.s32.totalorder %s2338_s18, %s2339_s26  ;;  %s2343_s22 = scalar_lea.hbm %s3509_s15, 2 }
  0x1f   : > { %643 = vmatpush.msra.mxu3 %v499_v9  ;;  %2245 = vmatpush.msra.mxu2 %v500_v12  ;;  %v2566_v15 = vld [vmem:[%s2562_s29] sm:$0xff]  ;;  %v493_v19 = vld [vmem:[%s2562_s29 + $0x8] sm:$0xff]  ;;  %v2036_v22 = vld [vmem:[%s3495_s1 + $0xf0] sm:$0xff]  ;;  %p2345_p1 = scmp.lt.s32.totalorder %s2343_s22, %s2339_s26 }
  0x20   : > { %545 = vmatpush.msra.mxu0 %v1990_v10  ;;  %574 = vmatpush.msra.mxu1 %v1991_v11  ;;  %v496_v18 = vld [vmem:[%s3495_s1] sm:$0xff]  ;;  %v2016_v23 = vld [vmem:[%s3495_s1 + $0x90] sm:$0xff]  ;;  %v2035_v24 = vld [vmem:[%s3495_s1 + $0xe8] sm:$0xff]  ;;  %p2341_p12 = pnand %p2340_p11, %p2505_p5 }
  0x21   : > { %644 = vmatpush.msra.mxu3 %v497_v13  ;;  %1998 = vmatmul.msk.f32.vlgmr.msra.gmra.mxu0 %vm517_vm0, %v504_v14  ;;  %v2018_v20 = vld [vmem:[%s3495_s1 + $0xa0] sm:$0xff]  ;;  %v505_v25 = vld [vmem:[%s2562_s29 + $0x9] sm:$0xff]  ;;  %v2021_v29 = vld [vmem:[%s3495_s1 + $0xb8] sm:$0xff]  ;;  %p2346_p2 = por %p2345_p1, %p2344_p0 }
  0x22   : > { %2002 = vmatmul.msk.f32.vlgmr.msra.gmra.mxu1 %vm517_vm0, %v504_v14  ;;  %2010 = vmatmul.msk.f32.vlgmr.msra.gmra.mxu3 %vm517_vm0, %v2566_v15  ;;  %v2034_v26 = vld [vmem:[%s3495_s1 + $0xe0] sm:$0xff]  ;;  %v2032_v27 = vld [vmem:[%s3495_s1 + $0xd0] sm:$0xff]  ;;  %v2033_v31 = vld [vmem:[%s3495_s1 + $0xd8] sm:$0xff]  ;;  %p2342_p13 = pneg %p2341_p12 }
  0x23   : > { %2246 = vmatpush.msra.mxu2 %v498_v16  ;;  %612 = vmatpush.msrb.mxu1 %v502_v8  ;;  %v2014_v28 = vld [vmem:[%s3495_s1 + $0x80] sm:$0xff]  ;;  %v494_v32 = vld [vmem:[%s2562_s29 + $0x10] sm:$0xff]  ;;  %v2019_v33 = vld [vmem:[%s3495_s1 + $0xa8] sm:$0xff] }
  0x24   : > { %695 = vmatpush.msrb.mxu0 %v2020_v17  ;;  %815 = vmatpush.msrb.mxu3 %v2037_v21  ;;  %v2030_v30 = vld [vmem:[%s3495_s1 + $0xc0] sm:$0xff]  ;;  %v2031_v34 = vld [vmem:[%s3495_s1 + $0xc8] sm:$0xff]  ;;  %v2017_v35 = vld [vmem:[%s3495_s1 + $0x98] sm:$0xff]  ;;  %p2347_p3 = pnand %p2346_p2, %p2342_p13 }
  0x25   : > { %2247 = vmatpush.msra.mxu2 %v496_v18  ;;  %613 = vmatpush.msrb.mxu1 %v500_v12  ;;  %v506_v36 = vld [vmem:[%s2562_s29 + $0x11] sm:$0xff]  ;;  %v2015_v37 = vld [vmem:[%s3495_s1 + $0x88] sm:$0xff]  ;;  %v507_v39 = vld [vmem:[%s2562_s29 + $0x19] sm:$0xf] }
  0x26   : > { %2007 = vmatmul.msk.f32.vlgmr.msra.gmra.mxu2 %vm517_vm0, %v493_v19  ;;  %696 = vmatpush.msrb.mxu0 %v2018_v20  ;;  %v495_v38 = vld [vmem:[%s2562_s29 + $0x18] sm:$0xf]  ;;  %v2052_v40 = vld [vmem:[%s3495_s1 + $0x130] sm:$0xff]  ;;  %v2050_v41 = vld [vmem:[%s3495_s1 + $0x120] sm:$0xff] }
  0x27   : > { %786 = vmatpush.msrb.mxu2 %v2036_v22  ;;  %614 = vmatpush.msrb.mxu1 %v498_v16  ;;  %v749_v42 = vld [vmem:[%s2562_s29 + $0x3] sm:$0xff]  ;;  %v2048_v43 = vld [vmem:[%s3495_s1 + $0x110] sm:$0xff]  ;;  %v2053_v46 = vld [vmem:[%s3495_s1 + $0x138] sm:$0xff] }
  0x28   : > { %697 = vmatpush.msrb.mxu0 %v2016_v23  ;;  %816 = vmatpush.msrb.mxu3 %v2035_v24  ;;  %v658_v44 = vld [vmem:[%s2562_s29 + $0x2] sm:$0xff]  ;;  %v750_v48 = vld [vmem:[%s2562_s29 + $0xb] sm:$0xff]  ;;  %v2049_v49 = vld [vmem:[%s3495_s1 + $0x118] sm:$0xff] }
  0x29   : > { %1999 = vmatmul.msk.f32.gmra.mxu0 %vm517_vm0, %v505_v25  ;;  %787 = vmatpush.msrb.mxu2 %v2034_v26  ;;  %v2046_v45 = vld [vmem:[%s3495_s1 + $0x100] sm:$0xff]  ;;  %v2051_v47 = vld [vmem:[%s3495_s1 + $0x128] sm:$0xff]  ;;  %v751_v52 = vld [vmem:[%s2562_s29 + $0x13] sm:$0xff] }
  0x2a   : > { %2003 = vmatmul.msk.f32.gmra.mxu1 %vm517_vm0, %v505_v25  ;;  %2011 = vmatmul.msk.f32.gmra.mxu3 %vm517_vm0, %v493_v19  ;;  %v659_v50 = vld [vmem:[%s2562_s29 + $0xa] sm:$0xff]  ;;  %v660_v53 = vld [vmem:[%s2562_s29 + $0x12] sm:$0xff]  ;;  %v752_v54 = vld [vmem:[%s2562_s29 + $0x1b] sm:$0xf] }
  0x2b   : > { %788 = vmatpush.msrb.mxu2 %v2032_v27  ;;  %615 = vmatpush.msrb.mxu1 %v496_v18  ;;  %v2047_v51 = vld [vmem:[%s3495_s1 + $0x108] sm:$0xff]  ;;  %v661_v55 = vld [vmem:[%s2562_s29 + $0x1a] sm:$0xf] }
  0x2c   : > { %698 = vmatpush.msrb.mxu0 %v2014_v28  ;;  %817 = vmatpush.msrb.mxu3 %v2033_v31  ;;  %v840_v56 = vld [vmem:[%s2562_s29 + $0x4] sm:$0xff]  ;;  %v841_v57 = vld [vmem:[%s2562_s29 + $0xc] sm:$0xff]  ;;  %v842_v58 = vld [vmem:[%s2562_s29 + $0x14] sm:$0xff] }
  0x2d   : > { %724 = vmatpush.msra.mxu1 %v2021_v29  ;;  %789 = vmatpush.msrb.mxu2 %v2030_v30  ;;  %v843_v59 = vld [vmem:[%s2562_s29 + $0x1c] sm:$0xf] }
  0x2e   : > { %2008 = vmatmul.msk.f32.gmra.mxu2 %vm517_vm0, %v494_v32  ;;  %818 = vmatpush.msrb.mxu3 %v2031_v34 }
  0x2f   : > { %725 = vmatpush.msra.mxu1 %v2019_v33  ;;  %877 = vmatpush.msra.mxu0 %v2052_v40 }
  0x31   : > { %726 = vmatpush.msra.mxu1 %v2017_v35  ;;  %2000 = vmatmul.msk.f32.gmra.mxu0 %vm517_vm0, %v506_v36 }
  0x32   : > { %2004 = vmatmul.msk.f32.gmra.mxu1 %vm517_vm0, %v506_v36  ;;  %2012 = vmatmul.msk.f32.gmra.mxu3 %vm517_vm0, %v494_v32 }
  0x33   : > { %727 = vmatpush.msra.mxu1 %v2015_v37  ;;  %878 = vmatpush.msra.mxu0 %v2050_v41  ;;  %v931_v41 = vld [vmem:[%s3496_s2] sm:$0x3] }
  0x35   : > { %879 = vmatpush.msra.mxu0 %v2048_v43 }
  0x36   : > { %2009 = vmatmul.msk.f32.gmra.mxu2 %vm517_vm0, %v495_v38 }
  0x37   : > { %880 = vmatpush.msra.mxu0 %v2046_v45 }
  0x39   : > { %2001 = vmatmul.msk.f32.gmra.mxu0 %vm517_vm0, %v507_v39 }
  0x3a   : > { %2005 = vmatmul.msk.f32.gmra.mxu1 %vm517_vm0, %v507_v39  ;;  %2013 = vmatmul.msk.f32.gmra.mxu3 %vm517_vm0, %v495_v38 }
  0x3e   : > { %2038 = vmatmul.msk.f32.vlgmr.msrb.gmra.mxu2 %vm517_vm0, %v749_v42 }
  0x41   : > { %2022 = vmatmul.msk.f32.vlgmr.msrb.gmra.mxu0 %vm517_vm0, %v658_v44 }
  0x42   : > { %2006 = vmatmul.msk.f32.vlgmr.msrb.gmra.mxu1 %vm517_vm0, %v2566_v15  ;;  %2042 = vmatmul.msk.f32.vlgmr.msrb.gmra.mxu3 %vm517_vm0, %v749_v42 }
  0x43   : > { %906 = vmatpush.msrb.mxu1 %v2053_v46 }
  0x45   : > { %907 = vmatpush.msrb.mxu1 %v2051_v47 }
  0x46   : > { %2039 = vmatmul.msk.f32.gmra.mxu2 %vm517_vm0, %v750_v48 }
  0x47   : > { %908 = vmatpush.msrb.mxu1 %v2049_v49 }
  0x49   : > { %2023 = vmatmul.msk.f32.gmra.mxu0 %vm517_vm0, %v659_v50  ;;  %909 = vmatpush.msrb.mxu1 %v2047_v51 }
  0x4a   : > { %2026 = vmatmul.msk.f32.vlgmr.msra.gmra.mxu1 %vm517_vm0, %v658_v44  ;;  %2043 = vmatmul.msk.f32.gmra.mxu3 %vm517_vm0, %v750_v48  ;;  %v933_v48 = vperm.slane %v931_v41, 0 }
  0x4e   : > { %2040 = vmatmul.msk.f32.gmra.mxu2 %vm517_vm0, %v751_v52 }
  0x51   : > { %2024 = vmatmul.msk.f32.gmra.mxu0 %vm517_vm0, %v660_v53 }
  0x52   : > { %2027 = vmatmul.msk.f32.gmra.mxu1 %vm517_vm0, %v659_v50  ;;  %2044 = vmatmul.msk.f32.gmra.mxu3 %vm517_vm0, %v751_v52 }
  0x56   : > { %2041 = vmatmul.msk.f32.gmra.mxu2 %vm517_vm0, %v752_v54 }
  0x59   : > { %2025 = vmatmul.msk.f32.gmra.mxu0 %vm517_vm0, %v661_v55 }
  0x5a   : > { %2028 = vmatmul.msk.f32.gmra.mxu1 %vm517_vm0, %v660_v53  ;;  %2045 = vmatmul.msk.f32.gmra.mxu3 %vm517_vm0, %v752_v54 }
  0x61   : > { %2054 = vmatmul.msk.f32.vlgmr.msra.gmra.mxu0 %vm517_vm0, %v840_v56 }
  0x62   : > { %2029 = vmatmul.msk.f32.gmra.mxu1 %vm517_vm0, %v661_v55 }
  0x69   : > { %2055 = vmatmul.msk.f32.gmra.mxu0 %vm517_vm0, %v841_v57 }
  0x6a   : > { %2058 = vmatmul.msk.f32.vlgmr.msrb.gmra.mxu1 %vm517_vm0, %v840_v56 }
  0x71   : > { %2056 = vmatmul.msk.f32.gmra.mxu0 %vm517_vm0, %v842_v58 }
  0x72   : > { %2059 = vmatmul.msk.f32.gmra.mxu1 %vm517_vm0, %v841_v57 }
  0x79   : > { %2057 = vmatmul.msk.f32.gmra.mxu0 %vm517_vm0, %v843_v59 }
  0x7a   : > { %2060 = vmatmul.msk.f32.gmra.mxu1 %vm517_vm0, %v842_v58 }
  0x82   : > { %2061 = vmatmul.msk.f32.gmra.mxu1 %vm517_vm0, %v843_v59 }
  0x9e   : > { %v547_v60 = vpop.f32.mrf.mxu0 }
  0x9f   : > { %v576_v61 = vpop.f32.mrf.mxu1 }
  0xa5   : > { %v646_v4 = vpop.f32.mrf.mxu3 }
  0xa6   : > { %v550_v62 = vpop.f32.mrf.mxu0  ;;  %v647_v58 = vadd.f32 %v646_v4, %v576_v61  ;;  %v1028_v61 = vld [vmem:[%s3498_s4 + $0x68] sm:$0xff] }
  0xa7   : > { %v579_v63 = vpop.f32.mrf.mxu1 }
  0xa9   : > { %v620_v2 = vpop.f32.mrf.mxu2 }
  0xaa   : > { %v621_v30 = vadd.f32 %v620_v2, %v550_v62  ;;  %v1030_v62 = vld [vmem:[%s3498_s4 + $0x78] sm:$0xff] }
  0xab   : > { %1043 = vmatpush.msrb.mxu0 %v1030_v62  ;;  %v2124_v62 = vld [vmem:[%s3499_s5 + $0x200] sm:$0xf] }
  0xad   : > { %v649_v9 = vpop.f32.mrf.mxu3 }
  0xae   : > { %v553_v0 = vpop.f32.mrf.mxu0  ;;  %v650_v52 = vadd.f32 %v649_v9, %v579_v63 }
  0xaf   : > { %v582_v1 = vpop.f32.mrf.mxu1 }
  0xb1   : > { %v623_v8 = vpop.f32.mrf.mxu2 }
  0xb2   : > { %v624_v28 = vadd.f32 %v623_v8, %v553_v0  ;;  %v1029_v0 = vld [vmem:[%s3498_s4 + $0x70] sm:$0xff]  ;;  %v1027_v8 = vld [vmem:[%s3498_s4 + $0x60] sm:$0xff] }
  0xb3   : > { %1044 = vmatpush.msrb.mxu0 %v1029_v0  ;;  %v2084_v0 = vld [vmem:[%s3499_s5 + $0x120] sm:$0xff] }
  0xb5   : > { %v652_v13 = vpop.f32.mrf.mxu3  ;;  %1045 = vmatpush.msrb.mxu0 %v1028_v61  ;;  %v2083_v61 = vld [vmem:[%s3499_s5 + $0x118] sm:$0xff] }
  0xb6   : > { %v556_v3 = vpop.f32.mrf.mxu0  ;;  %v653_v45 = vadd.f32 %v652_v13, %v582_v1 }
  0xb7   : > { %v585_v5 = vpop.f32.mrf.mxu1  ;;  %1046 = vmatpush.msrb.mxu0 %v1027_v8  ;;  %v1103_v8 = vld [vmem:[%s3499_s5 + $0x30] sm:$0xff] }
  0xb9   : > { %v626_v12 = vpop.f32.mrf.mxu2 }
  0xba   : > { %v627_v31 = vadd.f32 %v626_v12, %v556_v3 }
  0xbd   : > { %v655_v17 = vpop.f32.mrf.mxu3 }
  0xbe   : > { %v700_v6 = vpop.f32.mrf.mxu0  ;;  %v656_v53 = vadd.f32 %v655_v17, %v585_v5 }
  0xbf   : > { %v617_v7 = vpop.f32.mrf.mxu1 }
  0xc0   : > { %v618_v32 = vadd.f32 %v617_v7, %v547_v60 }
  0xc1   : > { %v791_v16 = vpop.f32.mrf.mxu2 }
  0xc2   : > { %v741_v39 = vadd.f32 %v700_v6, %v618_v32  ;;  %v1021_v32 = vld [vmem:[%s3498_s4 + $0x30] sm:$0xff] }
  0xc4   : > { %v832_v47 = vadd.f32 %v791_v16, %v741_v39 }
  0xc5   : > { %v820_v20 = vpop.f32.mrf.mxu3 }
  0xc6   : > { %v703_v10 = vpop.f32.mrf.mxu0 }
  0xc7   : > { %v729_v11 = vpop.f32.mrf.mxu1  ;;  %v743_v35 = vadd.f32 %v703_v10, %v621_v30  ;;  %v1034_v30 = vld [vmem:[%s3498_s4 + $0x98] sm:$0xff] }
  0xc8   : > { %v742_v63 = vadd.f32 %v729_v11, %v647_v58  ;;  %v934_v11 = vperm.slane %v931_v41, 1  ;;  %v1018_v41 = vld [vmem:[%s3498_s4 + $0x18] sm:$0xff] }
  0xc9   : > { %v794_v21 = vpop.f32.mrf.mxu2 }
  0xca   : > { %v834_v42 = vadd.f32 %v794_v21, %v743_v35  ;;  %v833_v10 = vadd.f32 %v820_v20, %v742_v63  ;;  %v1020_v35 = vld [vmem:[%s3498_s4 + $0x28] sm:$0xff]  ;;  %v2122_v63 = vld [vmem:[%s3499_s5 + $0x1f0] sm:$0xff] }
  0xcd   : > { %v823_v25 = vpop.f32.mrf.mxu3 }
  0xce   : > { %v706_v14 = vpop.f32.mrf.mxu0 }
  0xcf   : > { %v732_v15 = vpop.f32.mrf.mxu1  ;;  %v745_v33 = vadd.f32 %v706_v14, %v624_v28  ;;  %v1026_v14 = vld [vmem:[%s3498_s4 + $0x58] sm:$0xff]  ;;  %v953_v28 = vld [vmem:[%s3497_s3] sm:$0xff] }
  0xd0   : > { %v744_v59 = vadd.f32 %v732_v15, %v650_v52  ;;  %1047 = vmatpush.msrb.mxu0 %v1026_v14  ;;  %v2089_v52 = vld [vmem:[%s3499_s5 + $0x148] sm:$0xff]  ;;  %v2076_v14 = vld [vmem:[%s3499_s5 + $0xe0] sm:$0xff] }
  0xd1   : > { %v797_v27 = vpop.f32.mrf.mxu2 }
  0xd2   : > { %v836_v40 = vadd.f32 %v797_v27, %v745_v33  ;;  %v835_v5 = vadd.f32 %v823_v25, %v744_v59  ;;  %v1023_v25 = vld [vmem:[%s3498_s4 + $0x40] sm:$0xff]  ;;  %v1033_v33 = vld [vmem:[%s3498_s4 + $0x90] sm:$0xff] }
  0xd3   : > { %v1035_v27 = vld [vmem:[%s3498_s4 + $0xa0] sm:$0xff] }
  0xd5   : > { %v826_v37 = vpop.f32.mrf.mxu3 }
  0xd6   : > { %v709_v18 = vpop.f32.mrf.mxu0 }
  0xd7   : > { %v735_v19 = vpop.f32.mrf.mxu1  ;;  %v747_v36 = vadd.f32 %v709_v18, %v627_v31 }
  0xd8   : > { %v746_v54 = vadd.f32 %v735_v19, %v653_v45  ;;  %v1025_v19 = vld [vmem:[%s3498_s4 + $0x50] sm:$0xff]  ;;  %v1015_v45 = vld [vmem:[%s3498_s4] sm:$0xff] }
  0xd9   : > { %v800_v38 = vpop.f32.mrf.mxu2  ;;  %1048 = vmatpush.msrb.mxu0 %v1025_v19  ;;  %v2075_v19 = vld [vmem:[%s3499_s5 + $0xd8] sm:$0xff] }
  0xda   : > { %v838_v43 = vadd.f32 %v800_v38, %v747_v36  ;;  %v837_v3 = vadd.f32 %v826_v37, %v746_v54  ;;  %v1032_v36 = vld [vmem:[%s3498_s4 + $0x88] sm:$0xff]  ;;  %v1019_v38 = vld [vmem:[%s3498_s4 + $0x20] sm:$0xff]  ;;  %v2087_v54 = vld [vmem:[%s3499_s5 + $0x138] sm:$0xff] }
  0xdd   : > { %v829_v1 = vpop.f32.mrf.mxu3 }
  0xde   : > { %v882_v22 = vpop.f32.mrf.mxu0 }
  0xdf   : > { %v738_v23 = vpop.f32.mrf.mxu1  ;;  %v923_v55 = vadd.f32 %v882_v22, %v832_v47  ;;  %v1024_v22 = vld [vmem:[%s3498_s4 + $0x48] sm:$0xff]  ;;  %v1115_v47 = vld [vmem:[%s3499_s5 + $0x90] sm:$0xff] }
  0xe0   : > { %v748_v60 = vadd.f32 %v738_v23, %v656_v53  ;;  %1049 = vmatpush.msrb.mxu0 %v1024_v22  ;;  %v2086_v53 = vld [vmem:[%s3499_s5 + $0x130] sm:$0xff]  ;;  %v2072_v22 = vld [vmem:[%s3499_s5 + $0xc0] sm:$0xff] }
  0xe1   : > { %v937_v4 = vadd.f32 %v933_v48, %v923_v55  ;;  %v1111_v55 = vld [vmem:[%s3499_s5 + $0x70] sm:$0xff] }
  0xe2   : > { %v839_v6 = vadd.f32 %v829_v1, %v748_v60  ;;  %1050 = vmatpush.msrb.mxu0 %v1023_v25  ;;  %v1109_v60 = vld [vmem:[%s3499_s5 + $0x60] sm:$0xff]  ;;  %v2085_v1 = vld [vmem:[%s3499_s5 + $0x128] sm:$0xff]  ;;  %v2110_v25 = vld [vmem:[%s3499_s5 + $0x190] sm:$0xff] }
  0xe6   : > { %v885_v24 = vpop.f32.mrf.mxu0 }
  0xe7   : > { %v2706_v26 = vpop.f32.mrf.mxu1  ;;  %v925_v49 = vadd.f32 %v885_v24, %v834_v42  ;;  %v1031_v42 = vld [vmem:[%s3498_s4 + $0x80] sm:$0xff] }
  0xe8   : > { %v924_v16 = vadd.f32 %v2706_v26, %v833_v10  ;;  %v2078_v10 = vld [vmem:[%s3499_s5 + $0xf0] sm:$0xff] }
  0xe9   : > { %v939_v2 = vadd.f32 %v933_v48, %v925_v49  ;;  %v2091_v49 = vld [vmem:[%s3499_s5 + $0x158] sm:$0xf] }
  0xea   : > { %v938_v24 = vadd.f32 %v934_v11, %v924_v16  ;;  %2095 = vmatpush.msk.msra.mxu1 %vm962_vm1, %v2091_v49  ;;  %v1099_v16 = vld [vmem:[%s3499_s5 + $0x10] sm:$0xff]  ;;  %v2176_v49 = vld [vmem:[%s3499_s5 + $0x340] sm:$0xff] }
  0xec   : > { %1185 = vmatpush.msra.mxu1 %v2089_v52  ;;  %v2138_v52 = vld [vmem:[%s3499_s5 + $0x240] sm:$0xff] }
  0xee   : > { %v888_v29 = vpop.f32.mrf.mxu0  ;;  %1186 = vmatpush.msra.mxu1 %v2087_v54  ;;  %v1106_v54 = vld [vmem:[%s3499_s5 + $0x48] sm:$0xff] }
  0xef   : > { %v914_v34 = vpop.f32.mrf.mxu1  ;;  %v927_v44 = vadd.f32 %v888_v29, %v836_v40  ;;  %v1022_v29 = vld [vmem:[%s3498_s4 + $0x38] sm:$0xff]  ;;  %v954_v40 = vld [vmem:[%s3497_s3 + $0x8] sm:$0x3f] }
  0xf0   : > { %v926_v12 = vadd.f32 %v914_v34, %v835_v5  ;;  %1051 = vmatpush.msrb.mxu0 %v1022_v29  ;;  %1187 = vmatpush.msra.mxu1 %v2085_v1  ;;  %v2120_v5 = vld [vmem:[%s3499_s5 + $0x1e0] sm:$0xff]  ;;  %v1118_v29 = vld [vmem:[%s3499_s5 + $0xa8] sm:$0xf] }
  0xf1   : > { %v941_v56 = vadd.f32 %v933_v48, %v927_v44  ;;  %v1016_v44 = vld [vmem:[%s3498_s4 + $0x8] sm:$0xff] }
  0xf2   : > { %v940_v21 = vadd.f32 %v934_v11, %v926_v12  ;;  %1052 = vmatpush.msrb.mxu0 %v1021_v32  ;;  %1188 = vmatpush.msra.mxu1 %v2083_v61  ;;  %v1101_v12 = vld [vmem:[%s3499_s5 + $0x20] sm:$0xff]  ;;  %v2148_v32 = vld [vmem:[%s3499_s5 + $0x290] sm:$0xff]  ;;  %v1102_v1 = vld [vmem:[%s3499_s5 + $0x28] sm:$0xff] }
  0xf4   : > { %1053 = vmatpush.msrb.mxu0 %v1020_v35  ;;  %v2123_v35 = vld [vmem:[%s3499_s5 + $0x1f8] sm:$0xff] }
  0xf6   : > { %v891_v46 = vpop.f32.mrf.mxu0  ;;  %1054 = vmatpush.msrb.mxu0 %v1019_v38  ;;  %v2104_v38 = vld [vmem:[%s3499_s5 + $0x160] sm:$0xff] }
  0xf7   : > { %v929_v50 = vadd.f32 %v891_v46, %v838_v43  ;;  %v917_v51 = vpop.f32.mrf.mxu1  ;;  %v1017_v43 = vld [vmem:[%s3498_s4 + $0x10] sm:$0xff]  ;;  %v1117_v46 = vld [vmem:[%s3499_s5 + $0xa0] sm:$0xf] }
  0xf8   : > { %v928_v7 = vadd.f32 %v917_v51, %v837_v3  ;;  %1055 = vmatpush.msrb.mxu0 %v1018_v41  ;;  %v1113_v51 = vld [vmem:[%s3499_s5 + $0x80] sm:$0xff]  ;;  %v2082_v3 = vld [vmem:[%s3499_s5 + $0x110] sm:$0xff] }
  0xf9   : > { %v943_v57 = vadd.f32 %v933_v48, %v929_v50  ;;  %v2090_v48 = vld [vmem:[%s3499_s5 + $0x150] sm:$0xf]  ;;  %v2088_v50 = vld [vmem:[%s3499_s5 + $0x140] sm:$0xff] }
  0xfa   : > { %v942_v17 = vadd.f32 %v934_v11, %v928_v7  ;;  %1056 = vmatpush.msrb.mxu0 %v1017_v43  ;;  %v2081_v7 = vld [vmem:[%s3499_s5 + $0x108] sm:$0xff]  ;;  %v2180_v41 = vld [vmem:[%s3499_s5 + $0x360] sm:$0xf]  ;;  %v2119_v43 = vld [vmem:[%s3499_s5 + $0x1d8] sm:$0xff] }
  0xfb   : > { %2287 = vtanh.f32 %v943_v57  ;;  %1189 = vmatpush.msra.mxu1 %v2081_v7  ;;  %v2166_v7 = vld [vmem:[%s3499_s5 + $0x2f0] sm:$0xff] }
  0xfc   : > { %2289 = vtanh.f32 %v941_v56  ;;  %1057 = vmatpush.msrb.mxu0 %v1016_v44  ;;  %v2142_v44 = vld [vmem:[%s3499_s5 + $0x260] sm:$0xff] }
  0xfd   : > { %2291 = vtanh.f32 %v939_v2  ;;  %v1107_v2 = vld [vmem:[%s3499_s5 + $0x50] sm:$0xff] }
  0xfe   : > { %2293 = vtanh.f32 %v937_v4  ;;  %1058 = vmatpush.msrb.mxu0 %v1015_v45  ;;  %v1105_v4 = vld [vmem:[%s3499_s5 + $0x40] sm:$0xff]  ;;  %v2178_v45 = vld [vmem:[%s3499_s5 + $0x350] sm:$0xff] }
  0xff   : > { %v920_v9 = vpop.f32.mrf.mxu1 }
 0x100   : > { %v930_v13 = vadd.f32 %v920_v9, %v839_v6  ;;  %2126 = vmatpush.msk.msra.mxu0 %vm962_vm1, %v2124_v62  ;;  %v2080_v6 = vld [vmem:[%s3499_s5 + $0x100] sm:$0xff]  ;;  %v2118_v9 = vld [vmem:[%s3499_s5 + $0x1d0] sm:$0xff] }
 0x101   : > { %v2288_v15 = vpop.eup %2287  ;;  %v2134_v62 = vld [vmem:[%s3499_s5 + $0x220] sm:$0xff] }
 0x102   : > { %v944_v18 = vadd.f32 %v934_v11, %v930_v13  ;;  %2062 = vmatpush.msk.msra.mxu2 %vm962_vm1, %v2288_v15  ;;  %v2290_v20 = vpop.eup %2289  ;;  %1303 = vmatpush.msra.mxu0 %v2122_v63  ;;  %v2079_v11 = vld [vmem:[%s3499_s5 + $0xf8] sm:$0xff]  ;;  %v2116_v13 = vld [vmem:[%s3499_s5 + $0x1c0] sm:$0xff]  ;;  %v2077_v15 = vld [vmem:[%s3499_s5 + $0xe8] sm:$0xff] }
 0x103   : > { %v2292_v23 = vpop.eup %2291  ;;  %1190 = vmatpush.msra.mxu1 %v2079_v11  ;;  %v2132_v63 = vld [vmem:[%s3499_s5 + $0x210] sm:$0xff] }
 0x104   : > { %2295 = vtanh.f32 %v944_v18  ;;  %982 = vmatpush.msra.mxu2 %v2290_v20  ;;  %v2294_v26 = vpop.eup %2293  ;;  %1304 = vmatpush.msra.mxu0 %v2120_v5  ;;  %v2074_v18 = vld [vmem:[%s3499_s5 + $0xd0] sm:$0xff]  ;;  %v1097_v20 = vld [vmem:[%s3499_s5] sm:$0xff]  ;;  %v1100_v5 = vld [vmem:[%s3499_s5 + $0x18] sm:$0xff] }
 0x105   : > { %2297 = vtanh.f32 %v942_v17  ;;  %1191 = vmatpush.msra.mxu1 %v2077_v15  ;;  %v2114_v17 = vld [vmem:[%s3499_s5 + $0x1b0] sm:$0xff] }
 0x106   : > { %983 = vmatpush.msra.mxu2 %v2292_v23  ;;  %2299 = vtanh.f32 %v940_v21  ;;  %1305 = vmatpush.msra.mxu0 %v2118_v9  ;;  %v2112_v21 = vld [vmem:[%s3499_s5 + $0x1a0] sm:$0xff]  ;;  %v2073_v23 = vld [vmem:[%s3499_s5 + $0xc8] sm:$0xff]  ;;  %v2162_v11 = vld [vmem:[%s3499_s5 + $0x2d0] sm:$0xff] }
 0x107   : > { %2301 = vtanh.f32 %v938_v24  ;;  %1192 = vmatpush.msra.mxu1 %v2075_v19  ;;  %v2152_v24 = vld [vmem:[%s3499_s5 + $0x2b0] sm:$0xf]  ;;  %v2105_v9 = vld [vmem:[%s3499_s5 + $0x168] sm:$0xff]  ;;  %v2153_v19 = vld [vmem:[%s3499_s5 + $0x2b8] sm:$0xf] }
 0x108   : > { %984 = vmatpush.msra.mxu2 %v2294_v26  ;;  %1306 = vmatpush.msra.mxu0 %v2116_v13  ;;  %v2070_v26 = vld [vmem:[%s3499_s5 + $0xb0] sm:$0xff]  ;;  %v2160_v13 = vld [vmem:[%s3499_s5 + $0x2c0] sm:$0xff] }
 0x109   : > { %2063 = vmatmul.msk.f32.vlgmr.msra.gmra.mxu2 %vm955_vm2, %v953_v28  ;;  %1193 = vmatpush.msra.mxu1 %v2073_v23 }
 0x10a   : > { %v2296_v31 = vpop.eup %2295  ;;  %1077 = vmatpush.msrb.mxu2 %v1035_v27  ;;  %1307 = vmatpush.msra.mxu0 %v2114_v17  ;;  %v2071_v27 = vld [vmem:[%s3499_s5 + $0xb8] sm:$0xff] }
 0x10b   : > { %2065 = vmatpush.msk.msra.mxu3 %vm962_vm1, %v2296_v31  ;;  %v2298_v34 = vpop.eup %2297  ;;  %1194 = vmatpush.msra.mxu1 %v2071_v27  ;;  %v2125_v31 = vld [vmem:[%s3499_s5 + $0x208] sm:$0xf] }
 0x10c   : > { %1078 = vmatpush.msrb.mxu2 %v1034_v30  ;;  %v2300_v37 = vpop.eup %2299  ;;  %1308 = vmatpush.msra.mxu0 %v2112_v21  ;;  %v2108_v30 = vld [vmem:[%s3499_s5 + $0x180] sm:$0xff]  ;;  %v2177_v27 = vld [vmem:[%s3499_s5 + $0x348] sm:$0xff] }
 0x10d   : > { %1005 = vmatpush.msra.mxu3 %v2298_v34  ;;  %v2302_v39 = vpop.eup %2301  ;;  %2129 = vmatpush.msk.msrb.mxu1 %vm962_vm1, %v2125_v31  ;;  %v2106_v34 = vld [vmem:[%s3499_s5 + $0x170] sm:$0xff] }
 0x10e   : > { %1079 = vmatpush.msrb.mxu2 %v1033_v33  ;;  %1309 = vmatpush.msra.mxu0 %v2110_v25  ;;  %v1116_v33 = vld [vmem:[%s3499_s5 + $0x98] sm:$0xff] }
 0x10f   : > { %1006 = vmatpush.msra.mxu3 %v2300_v37  ;;  %v1114_v37 = vld [vmem:[%s3499_s5 + $0x88] sm:$0xff]  ;;  %1326 = vmatpush.msrb.mxu1 %v2123_v35  ;;  %v2179_v25 = vld [vmem:[%s3499_s5 + $0x358] sm:$0xff] }
 0x110   : > { %1080 = vmatpush.msrb.mxu2 %v1032_v36  ;;  %1310 = vmatpush.msra.mxu0 %v2108_v30  ;;  %v2146_v36 = vld [vmem:[%s3499_s5 + $0x280] sm:$0xff]  ;;  %v2175_v30 = vld [vmem:[%s3499_s5 + $0x338] sm:$0xff]  ;;  %v2143_v35 = vld [vmem:[%s3499_s5 + $0x268] sm:$0xff] }
 0x111   : > { %1007 = vmatpush.msra.mxu3 %v2302_v39  ;;  %2064 = vmatmul.msk.f32.gmra.mxu2 %vm955_vm2, %v954_v40  ;;  %v2121_v39 = vld [vmem:[%s3499_s5 + $0x1e8] sm:$0xff] }
 0x112   : > { %2066 = vmatmul.msk.f32.vlgmr.msra.gmra.mxu3 %vm955_vm2, %v953_v28  ;;  %1081 = vmatpush.msrb.mxu2 %v1031_v42  ;;  %v2150_v28 = vld [vmem:[%s3499_s5 + $0x2a0] sm:$0xff]  ;;  %v1112_v42 = vld [vmem:[%s3499_s5 + $0x78] sm:$0xff] }
 0x113   : > { %2092 = vmatpush.msk.msrb.mxu3 %vm962_vm1, %v2090_v48  ;;  %1311 = vmatpush.msra.mxu0 %v2106_v34  ;;  %v2140_v48 = vld [vmem:[%s3499_s5 + $0x250] sm:$0xff]  ;;  %v2173_v34 = vld [vmem:[%s3499_s5 + $0x328] sm:$0xff] }
 0x114   : > { %2098 = vmatpush.msk.msra.mxu2 %vm962_vm1, %v1117_v46  ;;  %1327 = vmatpush.msrb.mxu1 %v2121_v39  ;;  %v1110_v46 = vld [vmem:[%s3499_s5 + $0x68] sm:$0xff] }
 0x115   : > { %1162 = vmatpush.msrb.mxu3 %v2088_v50  ;;  %1312 = vmatpush.msra.mxu0 %v2104_v38  ;;  %v1108_v50 = vld [vmem:[%s3499_s5 + $0x58] sm:$0xff]  ;;  %v2169_v38 = vld [vmem:[%s3499_s5 + $0x308] sm:$0xff] }
 0x116   : > { %1220 = vmatpush.msra.mxu2 %v1115_v47  ;;  %v2117_v47 = vld [vmem:[%s3499_s5 + $0x1c8] sm:$0xff]  ;;  %1328 = vmatpush.msrb.mxu1 %v2119_v43  ;;  %v2137_v43 = vld [vmem:[%s3499_s5 + $0x238] sm:$0xff] }
 0x117   : > { %1163 = vmatpush.msrb.mxu3 %v2086_v53  ;;  %v2174_v53 = vld [vmem:[%s3499_s5 + $0x330] sm:$0xff] }
 0x118   : > { %1221 = vmatpush.msra.mxu2 %v1113_v51  ;;  %1329 = vmatpush.msrb.mxu1 %v2117_v47  ;;  %v2115_v51 = vld [vmem:[%s3499_s5 + $0x1b8] sm:$0xff] }
 0x119   : > { %1164 = vmatpush.msrb.mxu3 %v2084_v0  ;;  %v2170_v0 = vld [vmem:[%s3499_s5 + $0x310] sm:$0xff] }
 0x11a   : > { %2067 = vmatmul.msk.f32.gmra.mxu3 %vm955_vm2, %v954_v40  ;;  %1222 = vmatpush.msra.mxu2 %v1111_v55  ;;  %v2144_v40 = vld [vmem:[%s3499_s5 + $0x270] sm:$0xff] }
 0x11b   : > { %1165 = vmatpush.msrb.mxu3 %v2082_v3  ;;  %1330 = vmatpush.msrb.mxu1 %v2115_v51  ;;  %v2168_v3 = vld [vmem:[%s3499_s5 + $0x300] sm:$0xff] }
 0x11c   : > { %1223 = vmatpush.msra.mxu2 %v1109_v60  ;;  %v2111_v60 = vld [vmem:[%s3499_s5 + $0x198] sm:$0xff] }
 0x11d   : > { %1166 = vmatpush.msrb.mxu3 %v2080_v6  ;;  %v2107_v6 = vld [vmem:[%s3499_s5 + $0x178] sm:$0xff] }
 0x11e   : > { %1224 = vmatpush.msra.mxu2 %v1107_v2  ;;  %v2109_v2 = vld [vmem:[%s3499_s5 + $0x188] sm:$0xff] }
 0x11f   : > { %1167 = vmatpush.msrb.mxu3 %v2078_v10  ;;  %v2164_v10 = vld [vmem:[%s3499_s5 + $0x2e0] sm:$0xff] }
 0x120   : > { %1225 = vmatpush.msra.mxu2 %v1105_v4 }
 0x121   : > { %1168 = vmatpush.msrb.mxu3 %v2076_v14 }
 0x122   : > { %1226 = vmatpush.msra.mxu2 %v1103_v8  ;;  %v1098_v8 = vld [vmem:[%s3499_s5 + $0x8] sm:$0xff] }
 0x123   : > { %1169 = vmatpush.msrb.mxu3 %v2074_v18 }
 0x124   : > { %1227 = vmatpush.msra.mxu2 %v1101_v12 }
 0x125   : > { %1170 = vmatpush.msrb.mxu3 %v2072_v22 }
 0x126   : > { %1228 = vmatpush.msra.mxu2 %v1099_v16 }
 0x127   : > { %1171 = vmatpush.msrb.mxu3 %v2070_v26  ;;  %v2149_v26 = vld [vmem:[%s3499_s5 + $0x298] sm:$0xff] }
 0x128   : > { %1229 = vmatpush.msra.mxu2 %v1097_v20  ;;  %v2181_v20 = vld [vmem:[%s3499_s5 + $0x368] sm:$0xf] }
 0x129   : > { %2101 = vmatpush.msk.msra.mxu3 %vm962_vm1, %v1118_v29  ;;  %v2147_v29 = vld [vmem:[%s3499_s5 + $0x288] sm:$0xff] }
 0x12b   : > { %1243 = vmatpush.msra.mxu3 %v1116_v33  ;;  %v2145_v33 = vld [vmem:[%s3499_s5 + $0x278] sm:$0xff] }
 0x12d   : > { %1244 = vmatpush.msra.mxu3 %v1114_v37  ;;  %v2141_v37 = vld [vmem:[%s3499_s5 + $0x258] sm:$0xff] }
 0x12f   : > { %1245 = vmatpush.msra.mxu3 %v1112_v42  ;;  %v2167_v42 = vld [vmem:[%s3499_s5 + $0x2f8] sm:$0xff] }
 0x131   : > { %1246 = vmatpush.msra.mxu3 %v1110_v46  ;;  %v2163_v46 = vld [vmem:[%s3499_s5 + $0x2d8] sm:$0xff] }
 0x133   : > { %1247 = vmatpush.msra.mxu3 %v1108_v50 }
 0x135   : > { %1248 = vmatpush.msra.mxu3 %v1106_v54 }
 0x18c   : > { %v986_v56 = vpop.f32.mrf.mxu2 }
 0x18d   : > { %1059 = vmatmul.f32.vlgmr.msrb.gmra.mxu0 %v986_v56  ;;  %v2113_v56 = vld [vmem:[%s3499_s5 + $0x1a8] sm:$0xff] }
 0x18e   : > { %2182 = vmatpush.msk.msrb.mxu0 %vm962_vm1, %v2180_v41  ;;  %1331 = vmatpush.msrb.mxu1 %v2113_v56  ;;  %v2139_v41 = vld [vmem:[%s3499_s5 + $0x248] sm:$0xff] }
 0x190   : > { %1477 = vmatpush.msrb.mxu0 %v2178_v45  ;;  %1332 = vmatpush.msrb.mxu1 %v2111_v60  ;;  %v2135_v45 = vld [vmem:[%s3499_s5 + $0x228] sm:$0xff] }
 0x192   : > { %1478 = vmatpush.msrb.mxu0 %v2176_v49  ;;  %1333 = vmatpush.msrb.mxu1 %v2109_v2  ;;  %v2161_v49 = vld [vmem:[%s3499_s5 + $0x2c8] sm:$0xff] }
 0x194   : > { %v989_v57 = vpop.f32.mrf.mxu2  ;;  %1479 = vmatpush.msrb.mxu0 %v2174_v53  ;;  %1334 = vmatpush.msrb.mxu1 %v2107_v6 }
 0x195   : > { %v1009_v58 = vpop.f32.mrf.mxu3  ;;  %1062 = vmatmul.f32.gmra.mxu0 %v989_v57  ;;  %v2136_v57 = vld [vmem:[%s3499_s5 + $0x230] sm:$0xff] }
 0x196   : > { %2068 = vmatmul.msk.f32.vlgmr.msrb.gmra.mxu2 %vm1036_vm3, %v1009_v58  ;;  %v2172_v58 = vld [vmem:[%s3499_s5 + $0x320] sm:$0xff]  ;;  %1335 = vmatpush.msrb.mxu1 %v2105_v9 }
 0x197   : > { %2154 = vmatpush.msk.msrb.mxu2 %vm962_vm1, %v2152_v24  ;;  %1480 = vmatpush.msrb.mxu0 %v2172_v58  ;;  %v2151_v24 = vld [vmem:[%s3499_s5 + $0x2a8] sm:$0xff] }
 0x199   : > { %1390 = vmatpush.msrb.mxu2 %v2150_v28  ;;  %1481 = vmatpush.msrb.mxu0 %v2170_v0 }
 0x19b   : > { %1391 = vmatpush.msrb.mxu2 %v2148_v32  ;;  %1482 = vmatpush.msrb.mxu0 %v2168_v3 }
 0x19d   : > { %v1012_v59 = vpop.f32.mrf.mxu3  ;;  %1392 = vmatpush.msrb.mxu2 %v2146_v36  ;;  %1483 = vmatpush.msrb.mxu0 %v2166_v7  ;;  %v2171_v36 = vld [vmem:[%s3499_s5 + $0x318] sm:$0xff] }
 0x19e   : > { %2069 = vmatmul.msk.f32.gmra.mxu2 %vm1036_vm3, %v1012_v59  ;;  %v1104_v59 = vld [vmem:[%s3499_s5 + $0x38] sm:$0xff] }
 0x19f   : > { %1393 = vmatpush.msrb.mxu2 %v2144_v40  ;;  %1249 = vmatpush.msra.mxu3 %v1104_v59 }
 0x1a0   : > { %1484 = vmatpush.msrb.mxu0 %v2164_v10 }
 0x1a1   : > { %1394 = vmatpush.msrb.mxu2 %v2142_v44  ;;  %1250 = vmatpush.msra.mxu3 %v1102_v1  ;;  %v2165_v44 = vld [vmem:[%s3499_s5 + $0x2e8] sm:$0xff] }
 0x1a2   : > { %1485 = vmatpush.msrb.mxu0 %v2162_v11 }
 0x1a3   : > { %1395 = vmatpush.msrb.mxu2 %v2140_v48  ;;  %1251 = vmatpush.msra.mxu3 %v1100_v5  ;;  %v2133_v48 = vld [vmem:[%s3499_s5 + $0x218] sm:$0xff] }
 0x1a4   : > { %1486 = vmatpush.msrb.mxu0 %v2160_v13 }
 0x1a5   : > { %1396 = vmatpush.msrb.mxu2 %v2138_v52  ;;  %1252 = vmatpush.msra.mxu3 %v1098_v8 }
 0x1a7   : > { %1397 = vmatpush.msrb.mxu2 %v2136_v57 }
 0x1a9   : > { %1398 = vmatpush.msrb.mxu2 %v2134_v62 }
 0x1ab   : > { %1399 = vmatpush.msrb.mxu2 %v2132_v63  ;;  %v3151_v63 = vld [vmem:[%s3500_s6] sm:$0x3] }
 0x1ac   : > { %v1523_v6 = vperm.slane %v3151_v63, 0 }
 0x20a   : > { %v1060_v55 = vpop.f32.mrf.mxu0 }
 0x212   : > { %v1063_v12 = vpop.f32.mrf.mxu0 }
 0x219   : > { %v1083_v61 = vpop.f32.mrf.mxu2 }
 0x21a   : > { %v1084_v4 = vadd.f32 %v1083_v61, %v1060_v55 }
 0x21c   : > { %2303 = vtanh.f32 %v1084_v4 }
 0x221   : > { %v1086_v14 = vpop.f32.mrf.mxu2 }
 0x222   : > { %v2304_v15 = vpop.eup %2303  ;;  %v1087_v16 = vadd.f32 %v1086_v14, %v1063_v12  ;;  %v1602_v14 = vld [vmem:[%s3502_s8 + $0x78] sm:$0xff] }
 0x223   : > { %1092 = vst.msk [vmem:[#allocation2] sm:$0xff] %vm1091_vm4, %v2304_v15  ;;  %v1601_v15 = vld [vmem:[%s3502_s8 + $0x70] sm:$0xff] }
 0x224   : > { %2305 = vtanh.f32 %v1087_v16  ;;  %v1600_v16 = vld [vmem:[%s3502_s8 + $0x68] sm:$0xff] }
 0x22a   : > { %v2306_v17 = vpop.eup %2305  ;;  %v1095_v18 = vld [vmem:[#allocation2] sm:$0xff] }
 0x22b   : > { %1094 = vst.msk [vmem:[#allocation2 + $0x8] sm:$0x3f] %vm1093_vm5, %v2306_v17  ;;  %2099 = vmatmul.msk.f32.vlgmr.msra.gmra.mxu2 %vm1091_vm4, %v1095_v18  ;;  %v1599_v17 = vld [vmem:[%s3502_s8 + $0x60] sm:$0xff] }
 0x232   : > { %v1119_v21 = vld [vmem:[#allocation2 + $0x1] sm:$0xff]  ;;  %v1120_v28 = vld [vmem:[#allocation2 + $0x9] sm:$0x3]  ;;  %v1348_v39 = vld [vmem:[#allocation2 + $0xb] sm:$0x3] }
 0x233   : > { %v1096_v22 = vld [vmem:[#allocation2 + $0x8] sm:$0x3]  ;;  %2093 = vmatmul.msk.f32.vlgmr.msrb.gmra.mxu3 %vm1091_vm4, %v1119_v21  ;;  %2096 = vmatmul.msk.f32.vlgmr.msra.gmra.mxu1 %vm1091_vm4, %v1119_v21  ;;  %v1261_v31 = vld [vmem:[#allocation2 + $0xa] sm:$0x3]  ;;  %v1435_v47 = vld [vmem:[#allocation2 + $0xc] sm:$0x3] }
 0x234   : > { %v1260_v23 = vld [vmem:[#allocation2 + $0x2] sm:$0xff]  ;;  %2100 = vmatmul.msk.f32.gmra.mxu2 %vm1091_vm4, %v1096_v22  ;;  %2157 = vmatpush.msk.msrb.mxu3 %vm962_vm1, %v2153_v19 }
 0x235   : > { %2127 = vmatmul.msk.f32.vlgmr.msra.gmra.mxu0 %vm1091_vm4, %v1260_v23  ;;  %2185 = vmatpush.msk.msra.mxu1 %vm962_vm1, %v2181_v20  ;;  %v1347_v32 = vld [vmem:[#allocation2 + $0x3] sm:$0xff]  ;;  %v1598_v20 = vld [vmem:[%s3502_s8 + $0x58] sm:$0xff] }
 0x236   : > { %1413 = vmatpush.msrb.mxu3 %v2151_v24  ;;  %v1434_v40 = vld [vmem:[#allocation2 + $0x4] sm:$0xff]  ;;  %1610 = vmatpush.msra.mxu0 %v1602_v14  ;;  %v1606_v24 = vld [vmem:[%s3502_s8 + $0x98] sm:$0xff] }
 0x237   : > { %1500 = vmatpush.msra.mxu1 %v2179_v25  ;;  %v1535_v25 = vld [vmem:[%s3501_s7] sm:$0x1f] }
 0x238   : > { %1414 = vmatpush.msrb.mxu3 %v2149_v26  ;;  %1611 = vmatpush.msra.mxu0 %v1601_v15  ;;  %v1597_v26 = vld [vmem:[%s3502_s8 + $0x50] sm:$0xff]  ;;  %v1654_v14 = vld [vmem:[%s3503_s9] sm:$0xff] }
 0x239   : > { %1501 = vmatpush.msra.mxu1 %v2177_v27  ;;  %v1605_v27 = vld [vmem:[%s3502_s8 + $0x90] sm:$0xff] }
 0x23a   : > { %1415 = vmatpush.msrb.mxu3 %v2147_v29  ;;  %1612 = vmatpush.msra.mxu0 %v1600_v16  ;;  %v2193_v15 = vld [vmem:[%s3503_s9 + $0x50] sm:$0xff]  ;;  %v2236_v16 = vld [vmem:[%s3503_s9 + $0x188] sm:$0xff] }
 0x23b   : > { %2094 = vmatmul.msk.f32.gmra.mxu3 %vm1091_vm4, %v1120_v28  ;;  %2097 = vmatmul.msk.f32.gmra.mxu1 %vm1091_vm4, %v1120_v28 }
 0x23c   : > { %2155 = vmatmul.msk.f32.vlgmr.msrb.gmra.mxu2 %vm1091_vm4, %v1347_v32  ;;  %1502 = vmatpush.msra.mxu1 %v2175_v30  ;;  %v1596_v30 = vld [vmem:[%s3502_s8 + $0x48] sm:$0xff] }
 0x23d   : > { %2128 = vmatmul.msk.f32.gmra.mxu0 %vm1091_vm4, %v1261_v31  ;;  %1416 = vmatpush.msrb.mxu3 %v2145_v33  ;;  %v1595_v33 = vld [vmem:[%s3502_s8 + $0x40] sm:$0xff] }
 0x23e   : > { %1503 = vmatpush.msra.mxu1 %v2173_v34  ;;  %1613 = vmatpush.msra.mxu0 %v1599_v17  ;;  %v2210_v17 = vld [vmem:[%s3503_s9 + $0xc8] sm:$0xff] }
 0x23f   : > { %1417 = vmatpush.msrb.mxu3 %v2143_v35  ;;  %v1594_v35 = vld [vmem:[%s3502_s8 + $0x38] sm:$0xff] }
 0x240   : > { %1504 = vmatpush.msra.mxu1 %v2171_v36  ;;  %1614 = vmatpush.msra.mxu0 %v1598_v20  ;;  %v2234_v20 = vld [vmem:[%s3503_s9 + $0x178] sm:$0xff] }
 0x241   : > { %1418 = vmatpush.msrb.mxu3 %v2141_v37 }
 0x242   : > { %1505 = vmatpush.msra.mxu1 %v2169_v38  ;;  %1615 = vmatpush.msra.mxu0 %v1597_v26  ;;  %v1524_v38 = vperm.slane %v3151_v63, 1  ;;  %v2207_v26 = vld [vmem:[%s3503_s9 + $0xb0] sm:$0xff] }
 0x243   : > { %2102 = vmatmul.msk.f32.vlgmr.msra.gmra.mxu3 %vm1091_vm4, %v1095_v18  ;;  %2130 = vmatmul.msk.f32.vlgmr.msrb.gmra.mxu1 %vm1091_vm4, %v1260_v23 }
 0x244   : > { %2156 = vmatmul.msk.f32.gmra.mxu2 %vm1091_vm4, %v1348_v39  ;;  %1419 = vmatpush.msrb.mxu3 %v2139_v41 }
 0x245   : > { %2183 = vmatmul.msk.f32.vlgmr.msrb.gmra.mxu0 %vm1091_vm4, %v1434_v40  ;;  %1506 = vmatpush.msra.mxu1 %v2167_v42 }
 0x246   : > { %1420 = vmatpush.msrb.mxu3 %v2137_v43  ;;  %1616 = vmatpush.msra.mxu0 %v1596_v30  ;;  %v1592_v43 = vld [vmem:[%s3502_s8 + $0x28] sm:$0xff] }
 0x247   : > { %1507 = vmatpush.msra.mxu1 %v2165_v44  ;;  %v2206_v30 = vld [vmem:[%s3503_s9 + $0xa8] sm:$0xff] }
 0x248   : > { %1421 = vmatpush.msrb.mxu3 %v2135_v45  ;;  %1617 = vmatpush.msra.mxu0 %v1595_v33  ;;  %v2205_v33 = vld [vmem:[%s3503_s9 + $0xa0] sm:$0xff] }
 0x249   : > { %1508 = vmatpush.msra.mxu1 %v2163_v46  ;;  %v1591_v46 = vld [vmem:[%s3502_s8 + $0x20] sm:$0xff] }
 0x24a   : > { %1422 = vmatpush.msrb.mxu3 %v2133_v48  ;;  %1618 = vmatpush.msra.mxu0 %v1594_v35  ;;  %v2219_v35 = vld [vmem:[%s3503_s9 + $0x108] sm:$0xff] }
 0x24b   : > { %2103 = vmatmul.msk.f32.gmra.mxu3 %vm1091_vm4, %v1096_v22  ;;  %2131 = vmatmul.msk.f32.gmra.mxu1 %vm1091_vm4, %v1261_v31  ;;  %v1604_v31 = vld [vmem:[%s3502_s8 + $0x88] sm:$0xff] }
 0x24c   : > { %1509 = vmatpush.msra.mxu1 %v2161_v49  ;;  %v1590_v49 = vld [vmem:[%s3502_s8 + $0x18] sm:$0xff] }
 0x24d   : > { %2184 = vmatmul.msk.f32.gmra.mxu0 %vm1091_vm4, %v1435_v47 }
 0x253   : > { %2158 = vmatmul.msk.f32.vlgmr.msrb.gmra.mxu3 %vm1091_vm4, %v1347_v32  ;;  %2186 = vmatmul.msk.f32.vlgmr.msra.gmra.mxu1 %vm1091_vm4, %v1434_v40  ;;  %v1593_v40 = vld [vmem:[%s3502_s8 + $0x30] sm:$0xff] }
 0x254   : > { %1619 = vmatpush.msra.mxu0 %v1593_v40  ;;  %v2217_v40 = vld [vmem:[%s3503_s9 + $0xf8] sm:$0xff] }
 0x256   : > { %1620 = vmatpush.msra.mxu0 %v1592_v43  ;;  %v1847_v43 = vld [vmem:[%s3505_s11 + $0x68] sm:$0xff] }
 0x258   : > { %1621 = vmatpush.msra.mxu0 %v1591_v46  ;;  %v1845_v46 = vld [vmem:[%s3505_s11 + $0x58] sm:$0xff] }
 0x25a   : > { %1622 = vmatpush.msra.mxu0 %v1590_v49 }
 0x25b   : > { %2159 = vmatmul.msk.f32.gmra.mxu3 %vm1091_vm4, %v1348_v39  ;;  %2187 = vmatmul.msk.f32.gmra.mxu1 %vm1091_vm4, %v1435_v47 }
 0x2ae   : > { %v1231_v50 = vpop.f32.mrf.mxu2 }
 0x2b0   : > { %v1196_v51 = vpop.f32.mrf.mxu1 }
 0x2b2   : > { %v1314_v52 = vpop.f32.mrf.mxu0 }
 0x2b6   : > { %v1173_v53 = vpop.f32.mrf.mxu3 }
 0x2b7   : > { %v1234_v54 = vpop.f32.mrf.mxu2  ;;  %v1232_v57 = vadd.f32 %v1231_v50, %v1173_v53  ;;  %v1603_v50 = vld [vmem:[%s3502_s8 + $0x80] sm:$0xff]  ;;  %v1663_v53 = vld [vmem:[%s3503_s9 + $0x48] sm:$0xff] }
 0x2b8   : > { %v1199_v55 = vpop.f32.mrf.mxu1 }
 0x2b9   : > { %v1343_v0 = vadd.f32 %v1314_v52, %v1232_v57  ;;  %v1588_v52 = vld [vmem:[%s3502_s8 + $0x8] sm:$0xff]  ;;  %v1587_v57 = vld [vmem:[%s3502_s8] sm:$0xff] }
 0x2ba   : > { %v1317_v56 = vpop.f32.mrf.mxu0 }
 0x2be   : > { %v1176_v58 = vpop.f32.mrf.mxu3 }
 0x2bf   : > { %v1401_v59 = vpop.f32.mrf.mxu2  ;;  %v1235_v62 = vadd.f32 %v1234_v54, %v1176_v58  ;;  %v1662_v54 = vld [vmem:[%s3503_s9 + $0x40] sm:$0xff]  ;;  %v1661_v58 = vld [vmem:[%s3503_s9 + $0x38] sm:$0xff] }
 0x2c0   : > { %v1337_v1 = vpop.f32.mrf.mxu1  ;;  %v1430_v2 = vadd.f32 %v1401_v59, %v1343_v0  ;;  %v2200_v59 = vld [vmem:[%s3503_s9 + $0x88] sm:$0xff] }
 0x2c1   : > { %v1345_v61 = vadd.f32 %v1317_v56, %v1235_v62  ;;  %v2201_v56 = vld [vmem:[%s3503_s9 + $0x90] sm:$0xff]  ;;  %v2199_v62 = vld [vmem:[%s3503_s9 + $0x80] sm:$0xff]  ;;  %v1659_v0 = vld [vmem:[%s3503_s9 + $0x28] sm:$0xff] }
 0x2c2   : > { %v1488_v60 = vpop.f32.mrf.mxu0 }
 0x2c3   : > { %v1517_v5 = vadd.f32 %v1488_v60, %v1430_v2  ;;  %v1660_v60 = vld [vmem:[%s3503_s9 + $0x30] sm:$0xff]  ;;  %v1658_v2 = vld [vmem:[%s3503_s9 + $0x20] sm:$0xff] }
 0x2c5   : > { %v1527_v10 = vadd.f32 %v1523_v6, %v1517_v5  ;;  %v1657_v5 = vld [vmem:[%s3503_s9 + $0x18] sm:$0xff] }
 0x2c6   : > { %v1254_v3 = vpop.f32.mrf.mxu3 }
 0x2c7   : > { %v1404_v4 = vpop.f32.mrf.mxu2  ;;  %v1255_v19 = vadd.f32 %v1254_v3, %v1196_v51  ;;  %v1589_v51 = vld [vmem:[%s3502_s8 + $0x10] sm:$0xff]  ;;  %v2198_v3 = vld [vmem:[%s3503_s9 + $0x78] sm:$0xff] }
 0x2c8   : > { %v1432_v7 = vadd.f32 %v1404_v4, %v1345_v61  ;;  %v1340_v11 = vpop.f32.mrf.mxu1  ;;  %1623 = vmatpush.msra.mxu0 %v1589_v51  ;;  %v2197_v61 = vld [vmem:[%s3503_s9 + $0x70] sm:$0xff]  ;;  %v2214_v4 = vld [vmem:[%s3503_s9 + $0xe8] sm:$0xff] }
 0x2c9   : > { %v1344_v29 = vadd.f32 %v1337_v1, %v1255_v19  ;;  %v2235_v19 = vld [vmem:[%s3503_s9 + $0x180] sm:$0xff] }
 0x2ca   : > { %v1491_v8 = vpop.f32.mrf.mxu0  ;;  %1624 = vmatpush.msra.mxu0 %v1588_v52 }
 0x2cb   : > { %v1519_v9 = vadd.f32 %v1491_v8, %v1432_v7  ;;  %v2213_v7 = vld [vmem:[%s3503_s9 + $0xe0] sm:$0xff]  ;;  %v1656_v8 = vld [vmem:[%s3503_s9 + $0x10] sm:$0xff] }
 0x2cc   : > { %1625 = vmatpush.msra.mxu0 %v1587_v57  ;;  %v1842_v57 = vld [vmem:[%s3505_s11 + $0x40] sm:$0xff] }
 0x2cd   : > { %v1529_v12 = vadd.f32 %v1523_v6, %v1519_v9  ;;  %v2196_v6 = vld [vmem:[%s3503_s9 + $0x68] sm:$0xff]  ;;  %v2195_v9 = vld [vmem:[%s3503_s9 + $0x60] sm:$0xff] }
 0x2ce   : > { %v1257_v13 = vpop.f32.mrf.mxu3 }
 0x2cf   : > { %2307 = vtanh.f32 %v1529_v12  ;;  %v1258_v28 = vadd.f32 %v1257_v13, %v1199_v55  ;;  %v2202_v55 = vld [vmem:[%s3503_s9 + $0x98] sm:$0xff]  ;;  %v2211_v13 = vld [vmem:[%s3503_s9 + $0xd0] sm:$0xff] }
 0x2d0   : > { %2309 = vtanh.f32 %v1527_v10  ;;  %v1511_v22 = vpop.f32.mrf.mxu1  ;;  %1686 = vmatpush.msrb.mxu1 %v2202_v55  ;;  %v2212_v10 = vld [vmem:[%s3503_s9 + $0xd8] sm:$0xff]  ;;  %v1844_v55 = vld [vmem:[%s3505_s11 + $0x50] sm:$0xff] }
 0x2d1   : > { %v1346_v34 = vadd.f32 %v1340_v11, %v1258_v28  ;;  %v1655_v11 = vld [vmem:[%s3503_s9 + $0x8] sm:$0xff]  ;;  %v2194_v12 = vld [vmem:[%s3503_s9 + $0x58] sm:$0xff] }
 0x2d2   : > { %1687 = vmatpush.msrb.mxu1 %v2201_v56  ;;  %v2232_v28 = vld [vmem:[%s3503_s9 + $0x168] sm:$0xff] }
 0x2d3   : > { %v1843_v56 = vld [vmem:[%s3505_s11 + $0x48] sm:$0xff] }
 0x2d4   : > { %1688 = vmatpush.msrb.mxu1 %v2200_v59  ;;  %v1840_v59 = vld [vmem:[%s3505_s11 + $0x30] sm:$0xff] }
 0x2d5   : > { %v2308_v18 = vpop.eup %2307 }
 0x2d6   : > { %2188 = vmatpush.msk.msra.mxu2 %vm1540_vm6, %v2308_v18  ;;  %v2310_v21 = vpop.eup %2309  ;;  %v1424_v23 = vpop.f32.mrf.mxu3  ;;  %1689 = vmatpush.msrb.mxu1 %v2199_v62  ;;  %v2225_v18 = vld [vmem:[%s3503_s9 + $0x138] sm:$0xff]  ;;  %v1838_v62 = vld [vmem:[%s3505_s11 + $0x20] sm:$0xff] }
 0x2d7   : > { %v1431_v32 = vadd.f32 %v1424_v23, %v1344_v29  ;;  %v2208_v23 = vld [vmem:[%s3503_s9 + $0xb8] sm:$0xff]  ;;  %v2231_v29 = vld [vmem:[%s3503_s9 + $0x160] sm:$0xff] }
 0x2d8   : > { %1562 = vmatpush.msra.mxu2 %v2310_v21  ;;  %v1514_v41 = vpop.f32.mrf.mxu1  ;;  %1690 = vmatpush.msrb.mxu1 %v2198_v3  ;;  %v2209_v21 = vld [vmem:[%s3503_s9 + $0xc0] sm:$0xff]  ;;  %v1885_v3 = vld [vmem:[%s3507_s13 + $0x50] sm:$0xf] }
 0x2d9   : > { %2189 = vmatmul.msk.f32.vlgmr.msra.gmra.mxu2 %vm1536_vm7, %v1535_v25  ;;  %v1518_v37 = vadd.f32 %v1511_v22, %v1431_v32  ;;  %v2224_v22 = vld [vmem:[%s3503_s9 + $0x130] sm:$0xff]  ;;  %v2230_v32 = vld [vmem:[%s3503_s9 + $0x158] sm:$0xff]  ;;  %2239 = vmatpush.msk.msrb.mxu0 %vm962_vm1, %v1885_v3 }
 0x2da   : > { %1642 = vmatpush.msrb.mxu2 %v1606_v24  ;;  %1691 = vmatpush.msrb.mxu1 %v2197_v61  ;;  %v2233_v24 = vld [vmem:[%s3503_s9 + $0x170] sm:$0xff]  ;;  %v1884_v61 = vld [vmem:[%s3507_s13 + $0x48] sm:$0xff] }
 0x2db   : > { %v1528_v44 = vadd.f32 %v1524_v38, %v1518_v37  ;;  %v2218_v37 = vld [vmem:[%s3503_s9 + $0x100] sm:$0xff]  ;;  %1899 = vmatpush.msrb.mxu0 %v1884_v61 }
 0x2dc   : > { %1643 = vmatpush.msrb.mxu2 %v1605_v27  ;;  %1692 = vmatpush.msrb.mxu1 %v2196_v6  ;;  %v2222_v27 = vld [vmem:[%s3503_s9 + $0x120] sm:$0xff]  ;;  %v1881_v6 = vld [vmem:[%s3507_s13 + $0x30] sm:$0xff] }
 0x2de   : > { %1644 = vmatpush.msrb.mxu2 %v1604_v31  ;;  %v1427_v36 = vpop.f32.mrf.mxu3  ;;  %1693 = vmatpush.msrb.mxu1 %v2195_v9  ;;  %v2221_v31 = vld [vmem:[%s3503_s9 + $0x118] sm:$0xff] }
 0x2df   : > { %v1433_v39 = vadd.f32 %v1427_v36, %v1346_v34  ;;  %v2220_v34 = vld [vmem:[%s3503_s9 + $0x110] sm:$0xff] }
 0x2e0   : > { %1645 = vmatpush.msrb.mxu2 %v1603_v50  ;;  %1694 = vmatpush.msrb.mxu1 %v2194_v12  ;;  %v2229_v36 = vld [vmem:[%s3503_s9 + $0x150] sm:$0xff] }
 0x2e1   : > { %v1520_v42 = vadd.f32 %v1514_v41, %v1433_v39  ;;  %v2227_v39 = vld [vmem:[%s3503_s9 + $0x140] sm:$0xff]  ;;  %v2216_v41 = vld [vmem:[%s3503_s9 + $0xf0] sm:$0xff] }
 0x2e2   : > { %1744 = vmatpush.msra.mxu2 %v2214_v4  ;;  %1695 = vmatpush.msrb.mxu1 %v2193_v15  ;;  %v1883_v4 = vld [vmem:[%s3507_s13 + $0x40] sm:$0xff] }
 0x2e3   : > { %v1530_v45 = vadd.f32 %v1524_v38, %v1520_v42  ;;  %v2228_v38 = vld [vmem:[%s3503_s9 + $0x148] sm:$0xff]  ;;  %v1848_v42 = vld [vmem:[%s3505_s11 + $0x70] sm:$0xff]  ;;  %1900 = vmatpush.msrb.mxu0 %v1883_v4 }
 0x2e4   : > { %1745 = vmatpush.msra.mxu2 %v2213_v7  ;;  %1780 = vmatpush.msra.mxu1 %v2225_v18 }
 0x2e5   : > { %2311 = vtanh.f32 %v1530_v45 }
 0x2e6   : > { %2313 = vtanh.f32 %v1528_v44  ;;  %1746 = vmatpush.msra.mxu2 %v2212_v10  ;;  %1781 = vmatpush.msra.mxu1 %v2224_v22  ;;  %v1846_v44 = vld [vmem:[%s3505_s11 + $0x60] sm:$0xff]  ;;  %v1877_v22 = vld [vmem:[%s3507_s13 + $0x10] sm:$0xff] }
 0x2e8   : > { %1747 = vmatpush.msra.mxu2 %v2211_v13 }
 0x2ea   : > { %1748 = vmatpush.msra.mxu2 %v2210_v17 }
 0x2eb   : > { %v2312_v47 = vpop.eup %2311 }
 0x2ec   : > { %2190 = vmatpush.msk.msra.mxu3 %vm1540_vm6, %v2312_v47  ;;  %v2314_v48 = vpop.eup %2313  ;;  %1749 = vmatpush.msra.mxu2 %v2209_v21  ;;  %v1878_v21 = vld [vmem:[%s3507_s13 + $0x18] sm:$0xff] }
 0x2ee   : > { %1582 = vmatpush.msra.mxu3 %v2314_v48  ;;  %1750 = vmatpush.msra.mxu2 %v2208_v23  ;;  %v1876_v23 = vld [vmem:[%s3507_s13 + $0x8] sm:$0xff] }
 0x2ef   : > { %2191 = vmatmul.msk.f32.vlgmr.msra.gmra.mxu3 %vm1536_vm7, %v1535_v25  ;;  %v2223_v25 = vld [vmem:[%s3503_s9 + $0x128] sm:$0xff] }
 0x2f0   : > { %1709 = vmatpush.msrb.mxu3 %v1663_v53  ;;  %1782 = vmatpush.msra.mxu1 %v2223_v25  ;;  %v1849_v25 = vld [vmem:[%s3506_s12] sm:$0x1] }
 0x2f1   : > { %1751 = vmatpush.msra.mxu2 %v2207_v26 }
 0x2f2   : > { %1710 = vmatpush.msrb.mxu3 %v1662_v54  ;;  %1783 = vmatpush.msra.mxu1 %v2222_v27 }
 0x2f3   : > { %1752 = vmatpush.msra.mxu2 %v2206_v30 }
 0x2f4   : > { %1711 = vmatpush.msrb.mxu3 %v1661_v58  ;;  %1784 = vmatpush.msra.mxu1 %v2221_v31  ;;  %v1841_v58 = vld [vmem:[%s3505_s11 + $0x38] sm:$0xff] }
 0x2f5   : > { %1753 = vmatpush.msra.mxu2 %v2205_v33 }
 0x2f6   : > { %1712 = vmatpush.msrb.mxu3 %v1660_v60  ;;  %1785 = vmatpush.msra.mxu1 %v2220_v34  ;;  %v1839_v60 = vld [vmem:[%s3505_s11 + $0x28] sm:$0xff] }
 0x2f8   : > { %1713 = vmatpush.msrb.mxu3 %v1659_v0  ;;  %1786 = vmatpush.msra.mxu1 %v2219_v35  ;;  %v1837_v0 = vld [vmem:[%s3505_s11 + $0x18] sm:$0xff] }
 0x2fa   : > { %1714 = vmatpush.msrb.mxu3 %v1658_v2  ;;  %1787 = vmatpush.msra.mxu1 %v2218_v37  ;;  %v1835_v2 = vld [vmem:[%s3505_s11 + $0x8] sm:$0xff] }
 0x2fc   : > { %1715 = vmatpush.msrb.mxu3 %v1657_v5  ;;  %1788 = vmatpush.msra.mxu1 %v2217_v40  ;;  %v1882_v5 = vld [vmem:[%s3507_s13 + $0x38] sm:$0xff] }
 0x2fd   : > { %1901 = vmatpush.msrb.mxu0 %v1882_v5 }
 0x2fe   : > { %1716 = vmatpush.msrb.mxu3 %v1656_v8  ;;  %1789 = vmatpush.msra.mxu1 %v2216_v41  ;;  %v1880_v8 = vld [vmem:[%s3507_s13 + $0x28] sm:$0xff] }
 0x2ff   : > { %1902 = vmatpush.msrb.mxu0 %v1881_v6 }
 0x300   : > { %1717 = vmatpush.msrb.mxu3 %v1655_v11 }
 0x301   : > { %1903 = vmatpush.msrb.mxu0 %v1880_v8 }
 0x302   : > { %1718 = vmatpush.msrb.mxu3 %v1654_v14 }
 0x304   : > { %1816 = vmatpush.msra.mxu3 %v2236_v16  ;;  %v1831_v16 = vld [vmem:[%s3504_s10] sm:$0x1] }
 0x306   : > { %1817 = vmatpush.msra.mxu3 %v2235_v19 }
 0x308   : > { %1818 = vmatpush.msra.mxu3 %v2234_v20  ;;  %v1879_v20 = vld [vmem:[%s3507_s13 + $0x20] sm:$0xff] }
 0x309   : > { %1904 = vmatpush.msrb.mxu0 %v1879_v20 }
 0x30a   : > { %1819 = vmatpush.msra.mxu3 %v2233_v24  ;;  %v1875_v24 = vld [vmem:[%s3507_s13] sm:$0xff] }
 0x30b   : > { %1905 = vmatpush.msrb.mxu0 %v1878_v21 }
 0x30c   : > { %1820 = vmatpush.msra.mxu3 %v2232_v28 }
 0x30d   : > { %1906 = vmatpush.msrb.mxu0 %v1877_v22 }
 0x30e   : > { %1821 = vmatpush.msra.mxu3 %v2231_v29  ;;  %v1886_v29 = vld [vmem:[%s3508_s14] sm:$0x1] }
 0x30f   : > { %1907 = vmatpush.msrb.mxu0 %v1876_v23 }
 0x310   : > { %1822 = vmatpush.msra.mxu3 %v2230_v32 }
 0x311   : > { %1908 = vmatpush.msrb.mxu0 %v1875_v24 }
 0x312   : > { %1823 = vmatpush.msra.mxu3 %v2229_v36 }
 0x314   : > { %1824 = vmatpush.msra.mxu3 %v2228_v38 }
 0x316   : > { %1825 = vmatpush.msra.mxu3 %v2227_v39 }
 0x35c   : > { %v1564_v1 = vpop.f32.mrf.mxu2 }
 0x35d   : > { %1626 = vmatmul.f32.vlgmr.msra.gmra.mxu0 %v1564_v1  ;;  %v1836_v1 = vld [vmem:[%s3505_s11 + $0x10] sm:$0xff] }
 0x372   : > { %v1584_v63 = vpop.f32.mrf.mxu3 }
 0x373   : > { %2192 = vmatmul.msk.f32.vlgmr.msrb.gmra.mxu2 %vm517_vm0, %v1584_v63  ;;  %v1834_v63 = vld [vmem:[%s3505_s11] sm:$0xff] }
 0x374   : > { %1855 = vmatpush.msrb.mxu2 %v1848_v42 }
 0x376   : > { %1856 = vmatpush.msrb.mxu2 %v1847_v43 }
 0x378   : > { %1857 = vmatpush.msrb.mxu2 %v1846_v44 }
 0x37a   : > { %1858 = vmatpush.msrb.mxu2 %v1845_v46 }
 0x37c   : > { %1859 = vmatpush.msrb.mxu2 %v1844_v55 }
 0x37e   : > { %1860 = vmatpush.msrb.mxu2 %v1843_v56 }
 0x380   : > { %1861 = vmatpush.msrb.mxu2 %v1842_v57 }
 0x382   : > { %1862 = vmatpush.msrb.mxu2 %v1841_v58 }
 0x384   : > { %1863 = vmatpush.msrb.mxu2 %v1840_v59 }
 0x386   : > { %1864 = vmatpush.msrb.mxu2 %v1839_v60 }
 0x388   : > { %1865 = vmatpush.msrb.mxu2 %v1838_v62 }
 0x38a   : > { %1866 = vmatpush.msrb.mxu2 %v1837_v0 }
 0x38c   : > { %1867 = vmatpush.msrb.mxu2 %v1836_v1 }
 0x38e   : > { %1868 = vmatpush.msrb.mxu2 %v1835_v2 }
 0x390   : > { %1869 = vmatpush.msrb.mxu2 %v1834_v63 }
 0x3da   : > { %v1627_v45 = vpop.f32.mrf.mxu0 }
 0x3f6   : > { %v1647_v47 = vpop.f32.mrf.mxu2 }
 0x3f7   : > { %v1648_v48 = vadd.f32 %v1647_v47, %v1627_v45 }
 0x3f9   : > { %2315 = vtanh.f32 %v1648_v48 }
 0x3ff   : > { %v2316_v49 = vpop.eup %2315 }
 0x400   : > { %1652 = vst.msk [vmem:[#allocation3] sm:$0x1f] %vm1651_vm8, %v2316_v49 }
 0x407   : > { %v1653_v50 = vld [vmem:[#allocation3] sm:$0x1]  ;;  %v1664_v51 = vld [vmem:[#allocation3 + $0x1] sm:$0x1]  ;;  %v1723_v52 = vld [vmem:[#allocation3 + $0x2] sm:$0x1] }
 0x408   : > { %2204 = vmatmul.msk.f32.vlgmr.msrb.gmra.mxu3 %vm1676_vm9, %v1653_v50  ;;  %2203 = vmatmul.msk.f32.vlgmr.msrb.gmra.mxu1 %vm1676_vm9, %v1664_v51  ;;  %v1795_v53 = vld [vmem:[#allocation3 + $0x4] sm:$0x1]  ;;  %v1759_v54 = vld [vmem:[#allocation3 + $0x3] sm:$0x1] }
 0x409   : > { %2215 = vmatmul.msk.f32.vlgmr.msra.gmra.mxu2 %vm1676_vm9, %v1723_v52 }
 0x410   : > { %2237 = vmatmul.msk.f32.vlgmr.msra.gmra.mxu3 %vm1676_vm9, %v1795_v53  ;;  %2226 = vmatmul.msk.f32.vlgmr.msra.gmra.mxu1 %vm1676_vm9, %v1759_v54 }
 0x485   : > { %v1697_v7 = vpop.f32.mrf.mxu1 }
 0x48b   : > { %v1720_v9 = vpop.f32.mrf.mxu3 }
 0x48c   : > { %v1721_v10 = vadd.f32 %v1720_v9, %v1697_v7  ;;  %v1755_v11 = vpop.f32.mrf.mxu2 }
 0x48d   : > { %v1791_v13 = vpop.f32.mrf.mxu1 }
 0x48e   : > { %v1758_v12 = vadd.f32 %v1755_v11, %v1721_v10 }
 0x490   : > { %v1794_v14 = vadd.f32 %v1791_v13, %v1758_v12 }
 0x493   : > { %v1827_v15 = vpop.f32.mrf.mxu3 }
 0x494   : > { %v1830_v17 = vadd.f32 %v1827_v15, %v1794_v14 }
 0x496   : > { %v1832_v18 = vadd.f32 %v1831_v16, %v1830_v17 }
 0x498   : > { %2317 = vtanh.f32 %v1832_v18 }
 0x49e   : > { %v2318_v19 = vpop.eup %2317 }
 0x49f   : > { %2238 = vmatmul.msk.f32.vlgmr.msrb.gmra.mxu2 %vm1850_vm10, %v2318_v19 }
 0x522   : > { %v1871_v26 = vpop.f32.mrf.mxu2 }
 0x523   : > { %v1872_v27 = vadd.f32 %v1871_v26, %v1849_v25 }
 0x525   : > { %2319 = vtanh.f32 %v1872_v27 }
 0x52b   : > { %v2320_v28 = vpop.eup %2319 }
 0x52c   : > { %2240 = vmatmul.msk.f32.vlgmr.msrb.gmra.mxu0 %vm1091_vm4, %v2320_v28 }
 0x5a9   : > { %v1910_v30 = vpop.f32.mrf.mxu0 }
 0x5aa   : > { %v1911_v31 = vadd.f32 %v1910_v30, %v1886_v29 }
 0x5ac   : > { %2321 = vtanh.f32 %v1911_v31 }
 0x5b2   : > { %v2322_v32 = vpop.eup %2321 }
 0x5b3   : > { %1915 = vst.msk [vmem:[%s486_s21] sm:$0x1] %vm1914_vm11, %v2322_v32 }
 0x5b4   : > { %2350 = shalt.err (!%p2347_p3)
}
 0x5b5   : > { %2248 = dma.vmem_to_hbm [thread:$0]  (%p2505_p5), %s1928_s17, 16, %s1930_s23, %s1917_s25  }
 0x5b6 PF: > { %s3526_s24 = sld [smem:[#allocation9_spill]] }
 0x5b7   : > { %s3527_s16 = sld [smem:[#allocation7_spill]] }
 0x5bc   : > { %p2254_p4 = scmp.ge.s32.totalorder %s3526_s24, 2 }
 0x5bd   : > { %s1941_s0 = sand.u32 1, %s3527_s16  }
 0x5be   : > { %p2251_p7 = pnand %p2254_p4, %p2509_p6  ;;  %s1942_s29 = scalar_lea.sflag [#allocation5], %s1941_s0 }
 0x5c0   : > { %p2252_p8 = pneg %p2251_p7 }
 0x5c2   : > { %2368 = dma.done.wait (%p2252_p8), %s1942_s29, 16  }
 0x5c3   : > { %2370 = vsyncadd (%p2252_p8), %s1942_s29, 4294967280  ;;  %s3529_s21 = sld [smem:[#allocation10_spill]]  ;;  %s3532_s18 = smov %s2377_s19 }
 0x5c4   : > { %s3530_s26 = sld [smem:[#allocation8_spill]] }
 0x5c5   : > { %s3531_s20 = sld [smem:[#allocation11_spill]] }
 0x5c9   : > { %p25_p9 = scmp.ge.s32.totalorder %s3529_s21, 4  }
 0x5ca   : > { %s3533_s19 = smov %s3530_s26 }
 0x5cb   :  { %27 = sbr.rel (!%p25_p9) target bundleno = 5 (0x5), region = 127 }
 0x5d0   :  { %1947 = vsyncpa [#allocation5], 1 }
 0x5d1   :  { %1949 = vsyncpa [#allocation5 + $0x1], 1 }

</bundles_post_ra>
